<compile_context>
chip_gen: v6e
topology: v6e:2x2x1
jax: 0.10.0
libtpu: 0.0.40
codegen_flags: <defaults>
</compile_context>

<pallas_src>
import math

import jax
import jax.numpy as jnp
from jax.experimental import pallas as pl
from jax.experimental.pallas import tpu as pltpu


def _leaky_relu(x, slope=0.2):
    return jnp.where(x >= 0, x, slope * x)


def _rep_rows(a, k):
    """(R, C) -> (R*k, C), each row duplicated k times consecutively."""
    if k == 1:
        return a
    r, c = a.shape
    return jnp.broadcast_to(a[:, None, :], (r, k, c)).reshape(r * k, c)


# ------------------------------ fused kernel ------------------------------

def _make_generator_kernel(meta):
    layers = meta["layers"]
    pad_f = meta["pad_f"]
    last = len(layers) - 1

    def kernel(*refs):
        z_ref, o_ref = refs[0], refs[-1]
        w = refs[1:-1]

        # anc: lane-concatenated ancestor features [tree_0 | tree_1 | ...],
        # rows = current node count, last in_f columns == current tree level.
        anc = z_ref[0]                                            # (1, f0) fp32
        idx = 0
        y = None
        for l, m in enumerate(layers):
            deg, in_f, F = m["deg"], m["in_f"], m["F"]
            wcat_ref, wb_ref, wloop_ref = w[idx], w[idx + 1], w[idx + 2]
            idx += 3
            bias_ref = None
            if m["activation"]:
                bias_ref = w[idx]
                idx += 1

            # ---- root: ONE matmul over lane-concatenated ancestors, then a
            #      cheap row-repeat (no repeat folded into weight columns).
            root = jnp.dot(anc.astype(jnp.bfloat16), wcat_ref[...],
                           preferred_element_type=jnp.float32)    # (node, out_f)
            root_rows = _rep_rows(root, deg)                       # (nd, out_f)

            # ---- propagate ancestors to child resolution (row broadcast).
            anc_rep = _rep_rows(anc, deg)                          # (nd, F)
            xrep = anc_rep[:, F - in_f:]                           # (nd, in_f)

            # ---- branch: per-node vector @ W_branch contraction, done as
            #      in_f VPU broadcast-FMAs across all child rows at once.
            br = xrep[:, 0:1] * wb_ref[0]                          # (nd, in_f)
            for f in range(1, in_f):
                br = br + xrep[:, f:f + 1] * wb_ref[f]
            br = _leaky_relu(br)

            # ---- loop MLP: W_loop1 @ W_loop2 pre-multiplied -> one matmul,
            #      nodes folded into M (= node*degree).
            br = jnp.dot(br.astype(jnp.bfloat16), wloop_ref[...],
                         preferred_element_type=jnp.float32)       # (nd, out_f)

            y = root_rows + br
            if m["activation"]:
                y = _leaky_relu(y + bias_ref[...])                 # fp32
            if l != last:
                anc = jnp.concatenate([anc_rep, y], axis=1)        # (nd, F+out_f)

        nd, out_f = layers[-1]["nd"], layers[-1]["out_f"]
        if pad_f > out_f:                                          # lane-dense store
            y = jnp.concatenate(
                [y, jnp.zeros((nd, pad_f - out_f), jnp.float32)], axis=1)
        o_ref[0] = y

    return kernel


# --------------------------- weight pre-packing ---------------------------

def pack_generator_params(params):
    """One-time packing (plain JAX, outside the kernel)."""
    layers, packed = [], []
    F = 0
    for l, p in enumerate(params):
        node, deg = p["node"], p["degree"]
        in_f, out_f = p["in_f"], p["out_f"]
        nd = node * deg
        F += in_f                                  # sum of ancestor feature widths

        # Row-stacked root weights: one (F, out_f) matmul per layer.
        wcat = jnp.concatenate([p["W_root"][j] for j in range(l + 1)],
                               axis=0).astype(jnp.bfloat16)
        # W_branch rearranged so the VPU FMA loop directly produces child rows:
        #   wb_rows[f, n*deg + d, j] = W_branch[n, f, d*in_f + j]
        wb_rows = (p["W_branch"]
                   .reshape(node, in_f, deg, in_f)
                   .transpose(1, 0, 2, 3)
                   .reshape(in_f, nd, in_f)).astype(jnp.float32)
        # The two loop Linears have no nonlinearity between them -> pre-multiply.
        wloop = (p["W_loop1"] @ p["W_loop2"]).astype(jnp.bfloat16)

        packed += [wcat, wb_rows, wloop]
        if p["activation"]:
            packed.append(jnp.tile(p["bias"], (node, 1)).astype(jnp.float32))

        layers.append(dict(node=node, deg=deg, in_f=in_f, out_f=out_f,
                           F=F, nd=nd, activation=p["activation"]))

    out_f = layers[-1]["out_f"]
    meta = dict(layers=layers, nd=layers[-1]["nd"], out_f=out_f,
                pad_f=((out_f + 127) // 128) * 128)
    return packed, meta


def generator_forward(z, packed, meta):
    B = z.shape[0]
    f0 = meta["layers"][0]["in_f"]
    nd, out_f, pad_f = meta["nd"], meta["out_f"], meta["pad_f"]
    z3 = z.reshape(B, 1, f0)

    in_specs = [pl.BlockSpec((1, 1, f0), lambda i: (i, 0, 0))]
    for wgt in packed:
        zero_idx = (0,) * wgt.ndim
        in_specs.append(pl.BlockSpec(wgt.shape, lambda i, _z=zero_idx: _z))

    out = pl.pallas_call(
        _make_generator_kernel(meta),
        grid=(B,),
        in_specs=in_specs,
        out_specs=pl.BlockSpec((1, nd, pad_f), lambda i: (i, 0, 0)),
        out_shape=jax.ShapeDtypeStruct((B, nd, pad_f), jnp.float32),
        compiler_params=pltpu.CompilerParams(
            dimension_semantics=("parallel",),
            vmem_limit_bytes=32 * 1024 * 1024),
    )(z3, *packed)
    return out[:, :, :out_f]


# --------------------------- params / reference ---------------------------

def init_generator_params(key, features, degrees, support):
    layer_num = len(features) - 1
    assert layer_num == len(degrees)
    params, vertex_num = [], 1
    for inx in range(layer_num):
        in_f, out_f, deg = features[inx], features[inx + 1], degrees[inx]
        node = vertex_num
        key, *ks = jax.random.split(key, 6 + inx)
        wroots = [0.1 * jax.random.normal(ks[j], (features[j], out_f), jnp.float32)
                  for j in range(inx + 1)]
        w_branch = 0.1 * jax.random.normal(ks[inx + 1], (node, in_f, deg * in_f),
                                           jnp.float32)
        w_loop1 = 0.1 * jax.random.normal(ks[inx + 2], (in_f, in_f * support),
                                          jnp.float32)
        w_loop2 = 0.1 * jax.random.normal(ks[inx + 3], (in_f * support, out_f),
                                          jnp.float32)
        stdv = 1.0 / math.sqrt(out_f)
        bias = jax.random.uniform(ks[inx + 4], (deg, out_f), jnp.float32, -stdv, stdv)
        params.append(dict(W_root=wroots, W_branch=w_branch, W_loop1=w_loop1,
                           W_loop2=w_loop2, bias=bias, node=node, degree=deg,
                           in_f=in_f, out_f=out_f,
                           activation=(inx != layer_num - 1)))
        vertex_num *= deg
    return params


def generator_reference(z, params):
    """Pure-JAX reference mirroring the PyTorch forward."""
    tree = [z]
    B = z.shape[0]
    for p in params:
        node, deg, in_f = p["node"], p["degree"], p["in_f"]
        nd = node * deg
        root = 0.0
        for t, wr in zip(tree, p["W_root"]):
            rn = jnp.einsum("bnf,fo->bno", t, wr)
            root = root + jnp.repeat(rn, node // t.shape[1], axis=1)
        branch = jnp.einsum("bnf,nfg->bng", tree[-1], p["W_branch"])
        branch = _leaky_relu(branch).reshape(B, nd, in_f)
        branch = branch @ p["W_loop1"]
        branch = branch @ p["W_loop2"]
        branch = jnp.repeat(root, deg, axis=1) + branch
        if p["activation"]:
            branch = _leaky_relu(branch + jnp.tile(p["bias"], (node, 1))[None])
        tree = tree + [branch]
    return tree[-1]


if __name__ == "__main__":
    batch = 2
    features = [32, 16, 8, 3]   # last TreeGCN outputs xyz-like 3 features
    degrees = [2, 2, 4]         # total points = 2*2*4 = 16
    support = 4

    key = jax.random.PRNGKey(0)
    kz, kp = jax.random.split(key)
    params = init_generator_params(kp, features, degrees, support)
    z = jax.random.normal(kz, (batch, 1, features[0]), jnp.float32)

    # Pack once (hoisted out of the forward pass), jit the wrapper.
    packed, meta = pack_generator_params(params)
    fwd = jax.jit(lambda zz, pk: generator_forward(zz, pk, meta))

    out = jax.block_until_ready(fwd(z, packed))

    ref = generator_reference(z, params)
    assert out.shape == (batch, 16, features[-1]), out.shape
    assert bool(jnp.all(jnp.isfinite(out)))
    assert bool(jnp.allclose(out, ref, rtol=5e-2, atol=3e-2)), \
        float(jnp.max(jnp.abs(out - ref)))
    print("KERNEL_OK")
</pallas_src>

<mosaic_0001>
module attributes {stable_mosaic.version = 11 : i64} {
  func.func @kernel(%arg0: i32, %arg1: memref<1x1x32xf32, #tpu.memory_space<vmem>>, %arg2: memref<32x16xbf16, #tpu.memory_space<vmem>>, %arg3: memref<32x2x32xf32, #tpu.memory_space<vmem>>, %arg4: memref<32x16xbf16, #tpu.memory_space<vmem>>, %arg5: memref<2x16xf32, #tpu.memory_space<vmem>>, %arg6: memref<48x8xbf16, #tpu.memory_space<vmem>>, %arg7: memref<16x4x16xf32, #tpu.memory_space<vmem>>, %arg8: memref<16x8xbf16, #tpu.memory_space<vmem>>, %arg9: memref<4x8xf32, #tpu.memory_space<vmem>>, %arg10: memref<56x3xbf16, #tpu.memory_space<vmem>>, %arg11: memref<8x16x8xf32, #tpu.memory_space<vmem>>, %arg12: memref<8x3xbf16, #tpu.memory_space<vmem>>, %arg13: memref<1x16x128xf32, #tpu.memory_space<vmem>>) attributes {dimension_semantics = [#tpu.dimension_semantics<parallel>], iteration_bounds = array<i64: 2>, scalar_prefetch = 0 : i64, scratch_operands = 0 : i64, tpu.core_type = #tpu.core_type<tc>, window_params = [{transform_indices = @transform_0, window_bounds = array<i64: 1, 1, 32>}, {pipeline_mode = #tpu.pipeline_mode<synchronous>, transform_indices = @transform_1, window_bounds = array<i64: 32, 16>}, {pipeline_mode = #tpu.pipeline_mode<synchronous>, transform_indices = @transform_2, window_bounds = array<i64: 32, 2, 32>}, {pipeline_mode = #tpu.pipeline_mode<synchronous>, transform_indices = @transform_3, window_bounds = array<i64: 32, 16>}, {pipeline_mode = #tpu.pipeline_mode<synchronous>, transform_indices = @transform_4, window_bounds = array<i64: 2, 16>}, {pipeline_mode = #tpu.pipeline_mode<synchronous>, transform_indices = @transform_5, window_bounds = array<i64: 48, 8>}, {pipeline_mode = #tpu.pipeline_mode<synchronous>, transform_indices = @transform_6, window_bounds = array<i64: 16, 4, 16>}, {pipeline_mode = #tpu.pipeline_mode<synchronous>, transform_indices = @transform_7, window_bounds = array<i64: 16, 8>}, {pipeline_mode = #tpu.pipeline_mode<synchronous>, transform_indices = @transform_8, window_bounds = array<i64: 4, 8>}, {pipeline_mode = #tpu.pipeline_mode<synchronous>, transform_indices = @transform_9, window_bounds = array<i64: 56, 3>}, {pipeline_mode = #tpu.pipeline_mode<synchronous>, transform_indices = @transform_10, window_bounds = array<i64: 8, 16, 8>}, {pipeline_mode = #tpu.pipeline_mode<synchronous>, transform_indices = @transform_11, window_bounds = array<i64: 8, 3>}, {transform_indices = @transform_12, window_bounds = array<i64: 1, 16, 128>}]} {
    %c0 = arith.constant 0 : index
    %c0_0 = arith.constant 0 : index
    %c0_1 = arith.constant 0 : index
    %0 = vector.load %arg1[%c0, %c0_0, %c0_1] : memref<1x1x32xf32, #tpu.memory_space<vmem>>, vector<1x1x32xf32>
    %1 = vector.shape_cast %0 : vector<1x1x32xf32> to vector<1x32xf32>
    %2 = arith.truncf %1 : vector<1x32xf32> to vector<1x32xbf16>
    %c0_2 = arith.constant 0 : index
    %c0_3 = arith.constant 0 : index
    %3 = vector.load %arg2[%c0_2, %c0_3] : memref<32x16xbf16, #tpu.memory_space<vmem>>, vector<32x16xbf16>
    %cst = arith.constant dense<0.000000e+00> : vector<1x16xf32>
    %4 = tpu.matmul %2, %3, %cst {dimension_numbers = #tpu.dot_dimension_numbers<[1], [0], [0], [1], [0, 0, 1, 1], [], []>} : vector<1x32xbf16>, vector<32x16xbf16>, vector<1x16xf32> -> vector<1x16xf32>
    %5 = vector.shape_cast %4 : vector<1x16xf32> to vector<1x1x16xf32>
    %6 = vector.shape_cast %5 : vector<1x1x16xf32> to vector<1x1x16xf32>
    %7 = vector.broadcast %6 : vector<1x1x16xf32> to vector<1x2x16xf32>
    %8 = vector.shape_cast %7 : vector<1x2x16xf32> to vector<2x16xf32>
    %9 = vector.shape_cast %1 : vector<1x32xf32> to vector<1x1x32xf32>
    %10 = vector.shape_cast %9 : vector<1x1x32xf32> to vector<1x1x32xf32>
    %11 = vector.broadcast %10 : vector<1x1x32xf32> to vector<1x2x32xf32>
    %12 = vector.shape_cast %11 : vector<1x2x32xf32> to vector<2x32xf32>
    %13 = vector.extract_strided_slice %12 {offsets = [0, 0], sizes = [2, 1], strides = [1, 1]} : vector<2x32xf32> to vector<2x1xf32>
    %c0_4 = arith.constant 0 : index
    %c0_5 = arith.constant 0 : index
    %c0_6 = arith.constant 0 : index
    %14 = vector.load %arg3[%c0_4, %c0_5, %c0_6] : memref<32x2x32xf32, #tpu.memory_space<vmem>>, vector<1x2x32xf32>
    %15 = vector.shape_cast %14 : vector<1x2x32xf32> to vector<2x32xf32>
    %16 = vector.broadcast %13 : vector<2x1xf32> to vector<2x32xf32>
    %17 = arith.mulf %16, %15 : vector<2x32xf32>
    %18 = vector.extract_strided_slice %12 {offsets = [0, 1], sizes = [2, 1], strides = [1, 1]} : vector<2x32xf32> to vector<2x1xf32>
    %c1 = arith.constant 1 : index
    %c0_7 = arith.constant 0 : index
    %c0_8 = arith.constant 0 : index
    %19 = vector.load %arg3[%c1, %c0_7, %c0_8] : memref<32x2x32xf32, #tpu.memory_space<vmem>>, vector<1x2x32xf32>
    %20 = vector.shape_cast %19 : vector<1x2x32xf32> to vector<2x32xf32>
    %21 = vector.broadcast %18 : vector<2x1xf32> to vector<2x32xf32>
    %22 = arith.mulf %21, %20 : vector<2x32xf32>
    %23 = arith.addf %17, %22 : vector<2x32xf32>
    %24 = vector.extract_strided_slice %12 {offsets = [0, 2], sizes = [2, 1], strides = [1, 1]} : vector<2x32xf32> to vector<2x1xf32>
    %c2 = arith.constant 2 : index
    %c0_9 = arith.constant 0 : index
    %c0_10 = arith.constant 0 : index
    %25 = vector.load %arg3[%c2, %c0_9, %c0_10] : memref<32x2x32xf32, #tpu.memory_space<vmem>>, vector<1x2x32xf32>
    %26 = vector.shape_cast %25 : vector<1x2x32xf32> to vector<2x32xf32>
    %27 = vector.broadcast %24 : vector<2x1xf32> to vector<2x32xf32>
    %28 = arith.mulf %27, %26 : vector<2x32xf32>
    %29 = arith.addf %23, %28 : vector<2x32xf32>
    %30 = vector.extract_strided_slice %12 {offsets = [0, 3], sizes = [2, 1], strides = [1, 1]} : vector<2x32xf32> to vector<2x1xf32>
    %c3 = arith.constant 3 : index
    %c0_11 = arith.constant 0 : index
    %c0_12 = arith.constant 0 : index
    %31 = vector.load %arg3[%c3, %c0_11, %c0_12] : memref<32x2x32xf32, #tpu.memory_space<vmem>>, vector<1x2x32xf32>
    %32 = vector.shape_cast %31 : vector<1x2x32xf32> to vector<2x32xf32>
    %33 = vector.broadcast %30 : vector<2x1xf32> to vector<2x32xf32>
    %34 = arith.mulf %33, %32 : vector<2x32xf32>
    %35 = arith.addf %29, %34 : vector<2x32xf32>
    %36 = vector.extract_strided_slice %12 {offsets = [0, 4], sizes = [2, 1], strides = [1, 1]} : vector<2x32xf32> to vector<2x1xf32>
    %c4 = arith.constant 4 : index
    %c0_13 = arith.constant 0 : index
    %c0_14 = arith.constant 0 : index
    %37 = vector.load %arg3[%c4, %c0_13, %c0_14] : memref<32x2x32xf32, #tpu.memory_space<vmem>>, vector<1x2x32xf32>
    %38 = vector.shape_cast %37 : vector<1x2x32xf32> to vector<2x32xf32>
    %39 = vector.broadcast %36 : vector<2x1xf32> to vector<2x32xf32>
    %40 = arith.mulf %39, %38 : vector<2x32xf32>
    %41 = arith.addf %35, %40 : vector<2x32xf32>
    %42 = vector.extract_strided_slice %12 {offsets = [0, 5], sizes = [2, 1], strides = [1, 1]} : vector<2x32xf32> to vector<2x1xf32>
    %c5 = arith.constant 5 : index
    %c0_15 = arith.constant 0 : index
    %c0_16 = arith.constant 0 : index
    %43 = vector.load %arg3[%c5, %c0_15, %c0_16] : memref<32x2x32xf32, #tpu.memory_space<vmem>>, vector<1x2x32xf32>
    %44 = vector.shape_cast %43 : vector<1x2x32xf32> to vector<2x32xf32>
    %45 = vector.broadcast %42 : vector<2x1xf32> to vector<2x32xf32>
    %46 = arith.mulf %45, %44 : vector<2x32xf32>
    %47 = arith.addf %41, %46 : vector<2x32xf32>
    %48 = vector.extract_strided_slice %12 {offsets = [0, 6], sizes = [2, 1], strides = [1, 1]} : vector<2x32xf32> to vector<2x1xf32>
    %c6 = arith.constant 6 : index
    %c0_17 = arith.constant 0 : index
    %c0_18 = arith.constant 0 : index
    %49 = vector.load %arg3[%c6, %c0_17, %c0_18] : memref<32x2x32xf32, #tpu.memory_space<vmem>>, vector<1x2x32xf32>
    %50 = vector.shape_cast %49 : vector<1x2x32xf32> to vector<2x32xf32>
    %51 = vector.broadcast %48 : vector<2x1xf32> to vector<2x32xf32>
    %52 = arith.mulf %51, %50 : vector<2x32xf32>
    %53 = arith.addf %47, %52 : vector<2x32xf32>
    %54 = vector.extract_strided_slice %12 {offsets = [0, 7], sizes = [2, 1], strides = [1, 1]} : vector<2x32xf32> to vector<2x1xf32>
    %c7 = arith.constant 7 : index
    %c0_19 = arith.constant 0 : index
    %c0_20 = arith.constant 0 : index
    %55 = vector.load %arg3[%c7, %c0_19, %c0_20] : memref<32x2x32xf32, #tpu.memory_space<vmem>>, vector<1x2x32xf32>
    %56 = vector.shape_cast %55 : vector<1x2x32xf32> to vector<2x32xf32>
    %57 = vector.broadcast %54 : vector<2x1xf32> to vector<2x32xf32>
    %58 = arith.mulf %57, %56 : vector<2x32xf32>
    %59 = arith.addf %53, %58 : vector<2x32xf32>
    %60 = vector.extract_strided_slice %12 {offsets = [0, 8], sizes = [2, 1], strides = [1, 1]} : vector<2x32xf32> to vector<2x1xf32>
    %c8 = arith.constant 8 : index
    %c0_21 = arith.constant 0 : index
    %c0_22 = arith.constant 0 : index
    %61 = vector.load %arg3[%c8, %c0_21, %c0_22] : memref<32x2x32xf32, #tpu.memory_space<vmem>>, vector<1x2x32xf32>
    %62 = vector.shape_cast %61 : vector<1x2x32xf32> to vector<2x32xf32>
    %63 = vector.broadcast %60 : vector<2x1xf32> to vector<2x32xf32>
    %64 = arith.mulf %63, %62 : vector<2x32xf32>
    %65 = arith.addf %59, %64 : vector<2x32xf32>
    %66 = vector.extract_strided_slice %12 {offsets = [0, 9], sizes = [2, 1], strides = [1, 1]} : vector<2x32xf32> to vector<2x1xf32>
    %c9 = arith.constant 9 : index
    %c0_23 = arith.constant 0 : index
    %c0_24 = arith.constant 0 : index
    %67 = vector.load %arg3[%c9, %c0_23, %c0_24] : memref<32x2x32xf32, #tpu.memory_space<vmem>>, vector<1x2x32xf32>
    %68 = vector.shape_cast %67 : vector<1x2x32xf32> to vector<2x32xf32>
    %69 = vector.broadcast %66 : vector<2x1xf32> to vector<2x32xf32>
    %70 = arith.mulf %69, %68 : vector<2x32xf32>
    %71 = arith.addf %65, %70 : vector<2x32xf32>
    %72 = vector.extract_strided_slice %12 {offsets = [0, 10], sizes = [2, 1], strides = [1, 1]} : vector<2x32xf32> to vector<2x1xf32>
    %c10 = arith.constant 10 : index
    %c0_25 = arith.constant 0 : index
    %c0_26 = arith.constant 0 : index
    %73 = vector.load %arg3[%c10, %c0_25, %c0_26] : memref<32x2x32xf32, #tpu.memory_space<vmem>>, vector<1x2x32xf32>
    %74 = vector.shape_cast %73 : vector<1x2x32xf32> to vector<2x32xf32>
    %75 = vector.broadcast %72 : vector<2x1xf32> to vector<2x32xf32>
    %76 = arith.mulf %75, %74 : vector<2x32xf32>
    %77 = arith.addf %71, %76 : vector<2x32xf32>
    %78 = vector.extract_strided_slice %12 {offsets = [0, 11], sizes = [2, 1], strides = [1, 1]} : vector<2x32xf32> to vector<2x1xf32>
    %c11 = arith.constant 11 : index
    %c0_27 = arith.constant 0 : index
    %c0_28 = arith.constant 0 : index
    %79 = vector.load %arg3[%c11, %c0_27, %c0_28] : memref<32x2x32xf32, #tpu.memory_space<vmem>>, vector<1x2x32xf32>
    %80 = vector.shape_cast %79 : vector<1x2x32xf32> to vector<2x32xf32>
    %81 = vector.broadcast %78 : vector<2x1xf32> to vector<2x32xf32>
    %82 = arith.mulf %81, %80 : vector<2x32xf32>
    %83 = arith.addf %77, %82 : vector<2x32xf32>
    %84 = vector.extract_strided_slice %12 {offsets = [0, 12], sizes = [2, 1], strides = [1, 1]} : vector<2x32xf32> to vector<2x1xf32>
    %c12 = arith.constant 12 : index
    %c0_29 = arith.constant 0 : index
    %c0_30 = arith.constant 0 : index
    %85 = vector.load %arg3[%c12, %c0_29, %c0_30] : memref<32x2x32xf32, #tpu.memory_space<vmem>>, vector<1x2x32xf32>
    %86 = vector.shape_cast %85 : vector<1x2x32xf32> to vector<2x32xf32>
    %87 = vector.broadcast %84 : vector<2x1xf32> to vector<2x32xf32>
    %88 = arith.mulf %87, %86 : vector<2x32xf32>
    %89 = arith.addf %83, %88 : vector<2x32xf32>
    %90 = vector.extract_strided_slice %12 {offsets = [0, 13], sizes = [2, 1], strides = [1, 1]} : vector<2x32xf32> to vector<2x1xf32>
    %c13 = arith.constant 13 : index
    %c0_31 = arith.constant 0 : index
    %c0_32 = arith.constant 0 : index
    %91 = vector.load %arg3[%c13, %c0_31, %c0_32] : memref<32x2x32xf32, #tpu.memory_space<vmem>>, vector<1x2x32xf32>
    %92 = vector.shape_cast %91 : vector<1x2x32xf32> to vector<2x32xf32>
    %93 = vector.broadcast %90 : vector<2x1xf32> to vector<2x32xf32>
    %94 = arith.mulf %93, %92 : vector<2x32xf32>
    %95 = arith.addf %89, %94 : vector<2x32xf32>
    %96 = vector.extract_strided_slice %12 {offsets = [0, 14], sizes = [2, 1], strides = [1, 1]} : vector<2x32xf32> to vector<2x1xf32>
    %c14 = arith.constant 14 : index
    %c0_33 = arith.constant 0 : index
    %c0_34 = arith.constant 0 : index
    %97 = vector.load %arg3[%c14, %c0_33, %c0_34] : memref<32x2x32xf32, #tpu.memory_space<vmem>>, vector<1x2x32xf32>
    %98 = vector.shape_cast %97 : vector<1x2x32xf32> to vector<2x32xf32>
    %99 = vector.broadcast %96 : vector<2x1xf32> to vector<2x32xf32>
    %100 = arith.mulf %99, %98 : vector<2x32xf32>
    %101 = arith.addf %95, %100 : vector<2x32xf32>
    %102 = vector.extract_strided_slice %12 {offsets = [0, 15], sizes = [2, 1], strides = [1, 1]} : vector<2x32xf32> to vector<2x1xf32>
    %c15 = arith.constant 15 : index
    %c0_35 = arith.constant 0 : index
    %c0_36 = arith.constant 0 : index
    %103 = vector.load %arg3[%c15, %c0_35, %c0_36] : memref<32x2x32xf32, #tpu.memory_space<vmem>>, vector<1x2x32xf32>
    %104 = vector.shape_cast %103 : vector<1x2x32xf32> to vector<2x32xf32>
    %105 = vector.broadcast %102 : vector<2x1xf32> to vector<2x32xf32>
    %106 = arith.mulf %105, %104 : vector<2x32xf32>
    %107 = arith.addf %101, %106 : vector<2x32xf32>
    %108 = vector.extract_strided_slice %12 {offsets = [0, 16], sizes = [2, 1], strides = [1, 1]} : vector<2x32xf32> to vector<2x1xf32>
    %c16 = arith.constant 16 : index
    %c0_37 = arith.constant 0 : index
    %c0_38 = arith.constant 0 : index
    %109 = vector.load %arg3[%c16, %c0_37, %c0_38] : memref<32x2x32xf32, #tpu.memory_space<vmem>>, vector<1x2x32xf32>
    %110 = vector.shape_cast %109 : vector<1x2x32xf32> to vector<2x32xf32>
    %111 = vector.broadcast %108 : vector<2x1xf32> to vector<2x32xf32>
    %112 = arith.mulf %111, %110 : vector<2x32xf32>
    %113 = arith.addf %107, %112 : vector<2x32xf32>
    %114 = vector.extract_strided_slice %12 {offsets = [0, 17], sizes = [2, 1], strides = [1, 1]} : vector<2x32xf32> to vector<2x1xf32>
    %c17 = arith.constant 17 : index
    %c0_39 = arith.constant 0 : index
    %c0_40 = arith.constant 0 : index
    %115 = vector.load %arg3[%c17, %c0_39, %c0_40] : memref<32x2x32xf32, #tpu.memory_space<vmem>>, vector<1x2x32xf32>
    %116 = vector.shape_cast %115 : vector<1x2x32xf32> to vector<2x32xf32>
    %117 = vector.broadcast %114 : vector<2x1xf32> to vector<2x32xf32>
    %118 = arith.mulf %117, %116 : vector<2x32xf32>
    %119 = arith.addf %113, %118 : vector<2x32xf32>
    %120 = vector.extract_strided_slice %12 {offsets = [0, 18], sizes = [2, 1], strides = [1, 1]} : vector<2x32xf32> to vector<2x1xf32>
    %c18 = arith.constant 18 : index
    %c0_41 = arith.constant 0 : index
    %c0_42 = arith.constant 0 : index
    %121 = vector.load %arg3[%c18, %c0_41, %c0_42] : memref<32x2x32xf32, #tpu.memory_space<vmem>>, vector<1x2x32xf32>
    %122 = vector.shape_cast %121 : vector<1x2x32xf32> to vector<2x32xf32>
    %123 = vector.broadcast %120 : vector<2x1xf32> to vector<2x32xf32>
    %124 = arith.mulf %123, %122 : vector<2x32xf32>
    %125 = arith.addf %119, %124 : vector<2x32xf32>
    %126 = vector.extract_strided_slice %12 {offsets = [0, 19], sizes = [2, 1], strides = [1, 1]} : vector<2x32xf32> to vector<2x1xf32>
    %c19 = arith.constant 19 : index
    %c0_43 = arith.constant 0 : index
    %c0_44 = arith.constant 0 : index
    %127 = vector.load %arg3[%c19, %c0_43, %c0_44] : memref<32x2x32xf32, #tpu.memory_space<vmem>>, vector<1x2x32xf32>
    %128 = vector.shape_cast %127 : vector<1x2x32xf32> to vector<2x32xf32>
    %129 = vector.broadcast %126 : vector<2x1xf32> to vector<2x32xf32>
    %130 = arith.mulf %129, %128 : vector<2x32xf32>
    %131 = arith.addf %125, %130 : vector<2x32xf32>
    %132 = vector.extract_strided_slice %12 {offsets = [0, 20], sizes = [2, 1], strides = [1, 1]} : vector<2x32xf32> to vector<2x1xf32>
    %c20 = arith.constant 20 : index
    %c0_45 = arith.constant 0 : index
    %c0_46 = arith.constant 0 : index
    %133 = vector.load %arg3[%c20, %c0_45, %c0_46] : memref<32x2x32xf32, #tpu.memory_space<vmem>>, vector<1x2x32xf32>
    %134 = vector.shape_cast %133 : vector<1x2x32xf32> to vector<2x32xf32>
    %135 = vector.broadcast %132 : vector<2x1xf32> to vector<2x32xf32>
    %136 = arith.mulf %135, %134 : vector<2x32xf32>
    %137 = arith.addf %131, %136 : vector<2x32xf32>
    %138 = vector.extract_strided_slice %12 {offsets = [0, 21], sizes = [2, 1], strides = [1, 1]} : vector<2x32xf32> to vector<2x1xf32>
    %c21 = arith.constant 21 : index
    %c0_47 = arith.constant 0 : index
    %c0_48 = arith.constant 0 : index
    %139 = vector.load %arg3[%c21, %c0_47, %c0_48] : memref<32x2x32xf32, #tpu.memory_space<vmem>>, vector<1x2x32xf32>
    %140 = vector.shape_cast %139 : vector<1x2x32xf32> to vector<2x32xf32>
    %141 = vector.broadcast %138 : vector<2x1xf32> to vector<2x32xf32>
    %142 = arith.mulf %141, %140 : vector<2x32xf32>
    %143 = arith.addf %137, %142 : vector<2x32xf32>
    %144 = vector.extract_strided_slice %12 {offsets = [0, 22], sizes = [2, 1], strides = [1, 1]} : vector<2x32xf32> to vector<2x1xf32>
    %c22 = arith.constant 22 : index
    %c0_49 = arith.constant 0 : index
    %c0_50 = arith.constant 0 : index
    %145 = vector.load %arg3[%c22, %c0_49, %c0_50] : memref<32x2x32xf32, #tpu.memory_space<vmem>>, vector<1x2x32xf32>
    %146 = vector.shape_cast %145 : vector<1x2x32xf32> to vector<2x32xf32>
    %147 = vector.broadcast %144 : vector<2x1xf32> to vector<2x32xf32>
    %148 = arith.mulf %147, %146 : vector<2x32xf32>
    %149 = arith.addf %143, %148 : vector<2x32xf32>
    %150 = vector.extract_strided_slice %12 {offsets = [0, 23], sizes = [2, 1], strides = [1, 1]} : vector<2x32xf32> to vector<2x1xf32>
    %c23 = arith.constant 23 : index
    %c0_51 = arith.constant 0 : index
    %c0_52 = arith.constant 0 : index
    %151 = vector.load %arg3[%c23, %c0_51, %c0_52] : memref<32x2x32xf32, #tpu.memory_space<vmem>>, vector<1x2x32xf32>
    %152 = vector.shape_cast %151 : vector<1x2x32xf32> to vector<2x32xf32>
    %153 = vector.broadcast %150 : vector<2x1xf32> to vector<2x32xf32>
    %154 = arith.mulf %153, %152 : vector<2x32xf32>
    %155 = arith.addf %149, %154 : vector<2x32xf32>
    %156 = vector.extract_strided_slice %12 {offsets = [0, 24], sizes = [2, 1], strides = [1, 1]} : vector<2x32xf32> to vector<2x1xf32>
    %c24 = arith.constant 24 : index
    %c0_53 = arith.constant 0 : index
    %c0_54 = arith.constant 0 : index
    %157 = vector.load %arg3[%c24, %c0_53, %c0_54] : memref<32x2x32xf32, #tpu.memory_space<vmem>>, vector<1x2x32xf32>
    %158 = vector.shape_cast %157 : vector<1x2x32xf32> to vector<2x32xf32>
    %159 = vector.broadcast %156 : vector<2x1xf32> to vector<2x32xf32>
    %160 = arith.mulf %159, %158 : vector<2x32xf32>
    %161 = arith.addf %155, %160 : vector<2x32xf32>
    %162 = vector.extract_strided_slice %12 {offsets = [0, 25], sizes = [2, 1], strides = [1, 1]} : vector<2x32xf32> to vector<2x1xf32>
    %c25 = arith.constant 25 : index
    %c0_55 = arith.constant 0 : index
    %c0_56 = arith.constant 0 : index
    %163 = vector.load %arg3[%c25, %c0_55, %c0_56] : memref<32x2x32xf32, #tpu.memory_space<vmem>>, vector<1x2x32xf32>
    %164 = vector.shape_cast %163 : vector<1x2x32xf32> to vector<2x32xf32>
    %165 = vector.broadcast %162 : vector<2x1xf32> to vector<2x32xf32>
    %166 = arith.mulf %165, %164 : vector<2x32xf32>
    %167 = arith.addf %161, %166 : vector<2x32xf32>
    %168 = vector.extract_strided_slice %12 {offsets = [0, 26], sizes = [2, 1], strides = [1, 1]} : vector<2x32xf32> to vector<2x1xf32>
    %c26 = arith.constant 26 : index
    %c0_57 = arith.constant 0 : index
    %c0_58 = arith.constant 0 : index
    %169 = vector.load %arg3[%c26, %c0_57, %c0_58] : memref<32x2x32xf32, #tpu.memory_space<vmem>>, vector<1x2x32xf32>
    %170 = vector.shape_cast %169 : vector<1x2x32xf32> to vector<2x32xf32>
    %171 = vector.broadcast %168 : vector<2x1xf32> to vector<2x32xf32>
    %172 = arith.mulf %171, %170 : vector<2x32xf32>
    %173 = arith.addf %167, %172 : vector<2x32xf32>
    %174 = vector.extract_strided_slice %12 {offsets = [0, 27], sizes = [2, 1], strides = [1, 1]} : vector<2x32xf32> to vector<2x1xf32>
    %c27 = arith.constant 27 : index
    %c0_59 = arith.constant 0 : index
    %c0_60 = arith.constant 0 : index
    %175 = vector.load %arg3[%c27, %c0_59, %c0_60] : memref<32x2x32xf32, #tpu.memory_space<vmem>>, vector<1x2x32xf32>
    %176 = vector.shape_cast %175 : vector<1x2x32xf32> to vector<2x32xf32>
    %177 = vector.broadcast %174 : vector<2x1xf32> to vector<2x32xf32>
    %178 = arith.mulf %177, %176 : vector<2x32xf32>
    %179 = arith.addf %173, %178 : vector<2x32xf32>
    %180 = vector.extract_strided_slice %12 {offsets = [0, 28], sizes = [2, 1], strides = [1, 1]} : vector<2x32xf32> to vector<2x1xf32>
    %c28 = arith.constant 28 : index
    %c0_61 = arith.constant 0 : index
    %c0_62 = arith.constant 0 : index
    %181 = vector.load %arg3[%c28, %c0_61, %c0_62] : memref<32x2x32xf32, #tpu.memory_space<vmem>>, vector<1x2x32xf32>
    %182 = vector.shape_cast %181 : vector<1x2x32xf32> to vector<2x32xf32>
    %183 = vector.broadcast %180 : vector<2x1xf32> to vector<2x32xf32>
    %184 = arith.mulf %183, %182 : vector<2x32xf32>
    %185 = arith.addf %179, %184 : vector<2x32xf32>
    %186 = vector.extract_strided_slice %12 {offsets = [0, 29], sizes = [2, 1], strides = [1, 1]} : vector<2x32xf32> to vector<2x1xf32>
    %c29 = arith.constant 29 : index
    %c0_63 = arith.constant 0 : index
    %c0_64 = arith.constant 0 : index
    %187 = vector.load %arg3[%c29, %c0_63, %c0_64] : memref<32x2x32xf32, #tpu.memory_space<vmem>>, vector<1x2x32xf32>
    %188 = vector.shape_cast %187 : vector<1x2x32xf32> to vector<2x32xf32>
    %189 = vector.broadcast %186 : vector<2x1xf32> to vector<2x32xf32>
    %190 = arith.mulf %189, %188 : vector<2x32xf32>
    %191 = arith.addf %185, %190 : vector<2x32xf32>
    %192 = vector.extract_strided_slice %12 {offsets = [0, 30], sizes = [2, 1], strides = [1, 1]} : vector<2x32xf32> to vector<2x1xf32>
    %c30 = arith.constant 30 : index
    %c0_65 = arith.constant 0 : index
    %c0_66 = arith.constant 0 : index
    %193 = vector.load %arg3[%c30, %c0_65, %c0_66] : memref<32x2x32xf32, #tpu.memory_space<vmem>>, vector<1x2x32xf32>
    %194 = vector.shape_cast %193 : vector<1x2x32xf32> to vector<2x32xf32>
    %195 = vector.broadcast %192 : vector<2x1xf32> to vector<2x32xf32>
    %196 = arith.mulf %195, %194 : vector<2x32xf32>
    %197 = arith.addf %191, %196 : vector<2x32xf32>
    %198 = vector.extract_strided_slice %12 {offsets = [0, 31], sizes = [2, 1], strides = [1, 1]} : vector<2x32xf32> to vector<2x1xf32>
    %c31 = arith.constant 31 : index
    %c0_67 = arith.constant 0 : index
    %c0_68 = arith.constant 0 : index
    %199 = vector.load %arg3[%c31, %c0_67, %c0_68] : memref<32x2x32xf32, #tpu.memory_space<vmem>>, vector<1x2x32xf32>
    %200 = vector.shape_cast %199 : vector<1x2x32xf32> to vector<2x32xf32>
    %201 = vector.broadcast %198 : vector<2x1xf32> to vector<2x32xf32>
    %202 = arith.mulf %201, %200 : vector<2x32xf32>
    %203 = arith.addf %197, %202 : vector<2x32xf32>
    %cst_69 = arith.constant 0.000000e+00 : f32
    %204 = vector.broadcast %cst_69 : f32 to vector<2x32xf32>
    %205 = arith.cmpf oge, %203, %204 : vector<2x32xf32>
    %cst_70 = arith.constant 2.000000e-01 : f32
    %206 = vector.broadcast %cst_70 : f32 to vector<2x32xf32>
    %207 = arith.mulf %206, %203 : vector<2x32xf32>
    %208 = arith.select %205, %203, %207 : vector<2x32xi1>, vector<2x32xf32>
    %209 = arith.truncf %208 : vector<2x32xf32> to vector<2x32xbf16>
    %c0_71 = arith.constant 0 : index
    %c0_72 = arith.constant 0 : index
    %210 = vector.load %arg4[%c0_71, %c0_72] : memref<32x16xbf16, #tpu.memory_space<vmem>>, vector<32x16xbf16>
    %cst_73 = arith.constant dense<0.000000e+00> : vector<2x16xf32>
    %211 = tpu.matmul %209, %210, %cst_73 {dimension_numbers = #tpu.dot_dimension_numbers<[1], [0], [0], [1], [0, 0, 1, 1], [], []>} : vector<2x32xbf16>, vector<32x16xbf16>, vector<2x16xf32> -> vector<2x16xf32>
    %212 = arith.addf %8, %211 : vector<2x16xf32>
    %c0_74 = arith.constant 0 : index
    %c0_75 = arith.constant 0 : index
    %213 = vector.load %arg5[%c0_74, %c0_75] : memref<2x16xf32, #tpu.memory_space<vmem>>, vector<2x16xf32>
    %214 = arith.addf %212, %213 : vector<2x16xf32>
    %cst_76 = arith.constant 0.000000e+00 : f32
    %215 = vector.broadcast %cst_76 : f32 to vector<2x16xf32>
    %216 = arith.cmpf oge, %214, %215 : vector<2x16xf32>
    %cst_77 = arith.constant 2.000000e-01 : f32
    %217 = vector.broadcast %cst_77 : f32 to vector<2x16xf32>
    %218 = arith.mulf %217, %214 : vector<2x16xf32>
    %219 = arith.select %216, %214, %218 : vector<2x16xi1>, vector<2x16xf32>
    %220 = tpu.concatenate %12, %219 in 1 : vector<2x32xf32>, vector<2x16xf32> -> vector<2x48xf32>
    %221 = arith.truncf %220 : vector<2x48xf32> to vector<2x48xbf16>
    %c0_78 = arith.constant 0 : index
    %c0_79 = arith.constant 0 : index
    %222 = vector.load %arg6[%c0_78, %c0_79] : memref<48x8xbf16, #tpu.memory_space<vmem>>, vector<48x8xbf16>
    %cst_80 = arith.constant dense<0.000000e+00> : vector<2x8xf32>
    %223 = tpu.matmul %221, %222, %cst_80 {dimension_numbers = #tpu.dot_dimension_numbers<[1], [0], [0], [1], [0, 0, 1, 1], [], []>} : vector<2x48xbf16>, vector<48x8xbf16>, vector<2x8xf32> -> vector<2x8xf32>
    %224 = vector.shape_cast %223 : vector<2x8xf32> to vector<2x1x8xf32>
    %225 = vector.shape_cast %224 : vector<2x1x8xf32> to vector<2x1x8xf32>
    %226 = vector.broadcast %225 : vector<2x1x8xf32> to vector<2x2x8xf32>
    %227 = vector.shape_cast %226 : vector<2x2x8xf32> to vector<4x8xf32>
    %228 = vector.shape_cast %220 : vector<2x48xf32> to vector<2x1x48xf32>
    %229 = vector.shape_cast %228 : vector<2x1x48xf32> to vector<2x1x48xf32>
    %230 = vector.broadcast %229 : vector<2x1x48xf32> to vector<2x2x48xf32>
    %231 = vector.shape_cast %230 : vector<2x2x48xf32> to vector<4x48xf32>
    %232 = vector.extract_strided_slice %231 {offsets = [0, 32], sizes = [4, 16], strides = [1, 1]} : vector<4x48xf32> to vector<4x16xf32>
    %233 = vector.extract_strided_slice %232 {offsets = [0, 0], sizes = [4, 1], strides = [1, 1]} : vector<4x16xf32> to vector<4x1xf32>
    %c0_81 = arith.constant 0 : index
    %c0_82 = arith.constant 0 : index
    %c0_83 = arith.constant 0 : index
    %234 = vector.load %arg7[%c0_81, %c0_82, %c0_83] : memref<16x4x16xf32, #tpu.memory_space<vmem>>, vector<1x4x16xf32>
    %235 = vector.shape_cast %234 : vector<1x4x16xf32> to vector<4x16xf32>
    %236 = vector.broadcast %233 : vector<4x1xf32> to vector<4x16xf32>
    %237 = arith.mulf %236, %235 : vector<4x16xf32>
    %238 = vector.extract_strided_slice %232 {offsets = [0, 1], sizes = [4, 1], strides = [1, 1]} : vector<4x16xf32> to vector<4x1xf32>
    %c1_84 = arith.constant 1 : index
    %c0_85 = arith.constant 0 : index
    %c0_86 = arith.constant 0 : index
    %239 = vector.load %arg7[%c1_84, %c0_85, %c0_86] : memref<16x4x16xf32, #tpu.memory_space<vmem>>, vector<1x4x16xf32>
    %240 = vector.shape_cast %239 : vector<1x4x16xf32> to vector<4x16xf32>
    %241 = vector.broadcast %238 : vector<4x1xf32> to vector<4x16xf32>
    %242 = arith.mulf %241, %240 : vector<4x16xf32>
    %243 = arith.addf %237, %242 : vector<4x16xf32>
    %244 = vector.extract_strided_slice %232 {offsets = [0, 2], sizes = [4, 1], strides = [1, 1]} : vector<4x16xf32> to vector<4x1xf32>
    %c2_87 = arith.constant 2 : index
    %c0_88 = arith.constant 0 : index
    %c0_89 = arith.constant 0 : index
    %245 = vector.load %arg7[%c2_87, %c0_88, %c0_89] : memref<16x4x16xf32, #tpu.memory_space<vmem>>, vector<1x4x16xf32>
    %246 = vector.shape_cast %245 : vector<1x4x16xf32> to vector<4x16xf32>
    %247 = vector.broadcast %244 : vector<4x1xf32> to vector<4x16xf32>
    %248 = arith.mulf %247, %246 : vector<4x16xf32>
    %249 = arith.addf %243, %248 : vector<4x16xf32>
    %250 = vector.extract_strided_slice %232 {offsets = [0, 3], sizes = [4, 1], strides = [1, 1]} : vector<4x16xf32> to vector<4x1xf32>
    %c3_90 = arith.constant 3 : index
    %c0_91 = arith.constant 0 : index
    %c0_92 = arith.constant 0 : index
    %251 = vector.load %arg7[%c3_90, %c0_91, %c0_92] : memref<16x4x16xf32, #tpu.memory_space<vmem>>, vector<1x4x16xf32>
    %252 = vector.shape_cast %251 : vector<1x4x16xf32> to vector<4x16xf32>
    %253 = vector.broadcast %250 : vector<4x1xf32> to vector<4x16xf32>
    %254 = arith.mulf %253, %252 : vector<4x16xf32>
    %255 = arith.addf %249, %254 : vector<4x16xf32>
    %256 = vector.extract_strided_slice %232 {offsets = [0, 4], sizes = [4, 1], strides = [1, 1]} : vector<4x16xf32> to vector<4x1xf32>
    %c4_93 = arith.constant 4 : index
    %c0_94 = arith.constant 0 : index
    %c0_95 = arith.constant 0 : index
    %257 = vector.load %arg7[%c4_93, %c0_94, %c0_95] : memref<16x4x16xf32, #tpu.memory_space<vmem>>, vector<1x4x16xf32>
    %258 = vector.shape_cast %257 : vector<1x4x16xf32> to vector<4x16xf32>
    %259 = vector.broadcast %256 : vector<4x1xf32> to vector<4x16xf32>
    %260 = arith.mulf %259, %258 : vector<4x16xf32>
    %261 = arith.addf %255, %260 : vector<4x16xf32>
    %262 = vector.extract_strided_slice %232 {offsets = [0, 5], sizes = [4, 1], strides = [1, 1]} : vector<4x16xf32> to vector<4x1xf32>
    %c5_96 = arith.constant 5 : index
    %c0_97 = arith.constant 0 : index
    %c0_98 = arith.constant 0 : index
    %263 = vector.load %arg7[%c5_96, %c0_97, %c0_98] : memref<16x4x16xf32, #tpu.memory_space<vmem>>, vector<1x4x16xf32>
    %264 = vector.shape_cast %263 : vector<1x4x16xf32> to vector<4x16xf32>
    %265 = vector.broadcast %262 : vector<4x1xf32> to vector<4x16xf32>
    %266 = arith.mulf %265, %264 : vector<4x16xf32>
    %267 = arith.addf %261, %266 : vector<4x16xf32>
    %268 = vector.extract_strided_slice %232 {offsets = [0, 6], sizes = [4, 1], strides = [1, 1]} : vector<4x16xf32> to vector<4x1xf32>
    %c6_99 = arith.constant 6 : index
    %c0_100 = arith.constant 0 : index
    %c0_101 = arith.constant 0 : index
    %269 = vector.load %arg7[%c6_99, %c0_100, %c0_101] : memref<16x4x16xf32, #tpu.memory_space<vmem>>, vector<1x4x16xf32>
    %270 = vector.shape_cast %269 : vector<1x4x16xf32> to vector<4x16xf32>
    %271 = vector.broadcast %268 : vector<4x1xf32> to vector<4x16xf32>
    %272 = arith.mulf %271, %270 : vector<4x16xf32>
    %273 = arith.addf %267, %272 : vector<4x16xf32>
    %274 = vector.extract_strided_slice %232 {offsets = [0, 7], sizes = [4, 1], strides = [1, 1]} : vector<4x16xf32> to vector<4x1xf32>
    %c7_102 = arith.constant 7 : index
    %c0_103 = arith.constant 0 : index
    %c0_104 = arith.constant 0 : index
    %275 = vector.load %arg7[%c7_102, %c0_103, %c0_104] : memref<16x4x16xf32, #tpu.memory_space<vmem>>, vector<1x4x16xf32>
    %276 = vector.shape_cast %275 : vector<1x4x16xf32> to vector<4x16xf32>
    %277 = vector.broadcast %274 : vector<4x1xf32> to vector<4x16xf32>
    %278 = arith.mulf %277, %276 : vector<4x16xf32>
    %279 = arith.addf %273, %278 : vector<4x16xf32>
    %280 = vector.extract_strided_slice %232 {offsets = [0, 8], sizes = [4, 1], strides = [1, 1]} : vector<4x16xf32> to vector<4x1xf32>
    %c8_105 = arith.constant 8 : index
    %c0_106 = arith.constant 0 : index
    %c0_107 = arith.constant 0 : index
    %281 = vector.load %arg7[%c8_105, %c0_106, %c0_107] : memref<16x4x16xf32, #tpu.memory_space<vmem>>, vector<1x4x16xf32>
    %282 = vector.shape_cast %281 : vector<1x4x16xf32> to vector<4x16xf32>
    %283 = vector.broadcast %280 : vector<4x1xf32> to vector<4x16xf32>
    %284 = arith.mulf %283, %282 : vector<4x16xf32>
    %285 = arith.addf %279, %284 : vector<4x16xf32>
    %286 = vector.extract_strided_slice %232 {offsets = [0, 9], sizes = [4, 1], strides = [1, 1]} : vector<4x16xf32> to vector<4x1xf32>
    %c9_108 = arith.constant 9 : index
    %c0_109 = arith.constant 0 : index
    %c0_110 = arith.constant 0 : index
    %287 = vector.load %arg7[%c9_108, %c0_109, %c0_110] : memref<16x4x16xf32, #tpu.memory_space<vmem>>, vector<1x4x16xf32>
    %288 = vector.shape_cast %287 : vector<1x4x16xf32> to vector<4x16xf32>
    %289 = vector.broadcast %286 : vector<4x1xf32> to vector<4x16xf32>
    %290 = arith.mulf %289, %288 : vector<4x16xf32>
    %291 = arith.addf %285, %290 : vector<4x16xf32>
    %292 = vector.extract_strided_slice %232 {offsets = [0, 10], sizes = [4, 1], strides = [1, 1]} : vector<4x16xf32> to vector<4x1xf32>
    %c10_111 = arith.constant 10 : index
    %c0_112 = arith.constant 0 : index
    %c0_113 = arith.constant 0 : index
    %293 = vector.load %arg7[%c10_111, %c0_112, %c0_113] : memref<16x4x16xf32, #tpu.memory_space<vmem>>, vector<1x4x16xf32>
    %294 = vector.shape_cast %293 : vector<1x4x16xf32> to vector<4x16xf32>
    %295 = vector.broadcast %292 : vector<4x1xf32> to vector<4x16xf32>
    %296 = arith.mulf %295, %294 : vector<4x16xf32>
    %297 = arith.addf %291, %296 : vector<4x16xf32>
    %298 = vector.extract_strided_slice %232 {offsets = [0, 11], sizes = [4, 1], strides = [1, 1]} : vector<4x16xf32> to vector<4x1xf32>
    %c11_114 = arith.constant 11 : index
    %c0_115 = arith.constant 0 : index
    %c0_116 = arith.constant 0 : index
    %299 = vector.load %arg7[%c11_114, %c0_115, %c0_116] : memref<16x4x16xf32, #tpu.memory_space<vmem>>, vector<1x4x16xf32>
    %300 = vector.shape_cast %299 : vector<1x4x16xf32> to vector<4x16xf32>
    %301 = vector.broadcast %298 : vector<4x1xf32> to vector<4x16xf32>
    %302 = arith.mulf %301, %300 : vector<4x16xf32>
    %303 = arith.addf %297, %302 : vector<4x16xf32>
    %304 = vector.extract_strided_slice %232 {offsets = [0, 12], sizes = [4, 1], strides = [1, 1]} : vector<4x16xf32> to vector<4x1xf32>
    %c12_117 = arith.constant 12 : index
    %c0_118 = arith.constant 0 : index
    %c0_119 = arith.constant 0 : index
    %305 = vector.load %arg7[%c12_117, %c0_118, %c0_119] : memref<16x4x16xf32, #tpu.memory_space<vmem>>, vector<1x4x16xf32>
    %306 = vector.shape_cast %305 : vector<1x4x16xf32> to vector<4x16xf32>
    %307 = vector.broadcast %304 : vector<4x1xf32> to vector<4x16xf32>
    %308 = arith.mulf %307, %306 : vector<4x16xf32>
    %309 = arith.addf %303, %308 : vector<4x16xf32>
    %310 = vector.extract_strided_slice %232 {offsets = [0, 13], sizes = [4, 1], strides = [1, 1]} : vector<4x16xf32> to vector<4x1xf32>
    %c13_120 = arith.constant 13 : index
    %c0_121 = arith.constant 0 : index
    %c0_122 = arith.constant 0 : index
    %311 = vector.load %arg7[%c13_120, %c0_121, %c0_122] : memref<16x4x16xf32, #tpu.memory_space<vmem>>, vector<1x4x16xf32>
    %312 = vector.shape_cast %311 : vector<1x4x16xf32> to vector<4x16xf32>
    %313 = vector.broadcast %310 : vector<4x1xf32> to vector<4x16xf32>
    %314 = arith.mulf %313, %312 : vector<4x16xf32>
    %315 = arith.addf %309, %314 : vector<4x16xf32>
    %316 = vector.extract_strided_slice %232 {offsets = [0, 14], sizes = [4, 1], strides = [1, 1]} : vector<4x16xf32> to vector<4x1xf32>
    %c14_123 = arith.constant 14 : index
    %c0_124 = arith.constant 0 : index
    %c0_125 = arith.constant 0 : index
    %317 = vector.load %arg7[%c14_123, %c0_124, %c0_125] : memref<16x4x16xf32, #tpu.memory_space<vmem>>, vector<1x4x16xf32>
    %318 = vector.shape_cast %317 : vector<1x4x16xf32> to vector<4x16xf32>
    %319 = vector.broadcast %316 : vector<4x1xf32> to vector<4x16xf32>
    %320 = arith.mulf %319, %318 : vector<4x16xf32>
    %321 = arith.addf %315, %320 : vector<4x16xf32>
    %322 = vector.extract_strided_slice %232 {offsets = [0, 15], sizes = [4, 1], strides = [1, 1]} : vector<4x16xf32> to vector<4x1xf32>
    %c15_126 = arith.constant 15 : index
    %c0_127 = arith.constant 0 : index
    %c0_128 = arith.constant 0 : index
    %323 = vector.load %arg7[%c15_126, %c0_127, %c0_128] : memref<16x4x16xf32, #tpu.memory_space<vmem>>, vector<1x4x16xf32>
    %324 = vector.shape_cast %323 : vector<1x4x16xf32> to vector<4x16xf32>
    %325 = vector.broadcast %322 : vector<4x1xf32> to vector<4x16xf32>
    %326 = arith.mulf %325, %324 : vector<4x16xf32>
    %327 = arith.addf %321, %326 : vector<4x16xf32>
    %cst_129 = arith.constant 0.000000e+00 : f32
    %328 = vector.broadcast %cst_129 : f32 to vector<4x16xf32>
    %329 = arith.cmpf oge, %327, %328 : vector<4x16xf32>
    %cst_130 = arith.constant 2.000000e-01 : f32
    %330 = vector.broadcast %cst_130 : f32 to vector<4x16xf32>
    %331 = arith.mulf %330, %327 : vector<4x16xf32>
    %332 = arith.select %329, %327, %331 : vector<4x16xi1>, vector<4x16xf32>
    %333 = arith.truncf %332 : vector<4x16xf32> to vector<4x16xbf16>
    %c0_131 = arith.constant 0 : index
    %c0_132 = arith.constant 0 : index
    %334 = vector.load %arg8[%c0_131, %c0_132] : memref<16x8xbf16, #tpu.memory_space<vmem>>, vector<16x8xbf16>
    %cst_133 = arith.constant dense<0.000000e+00> : vector<4x8xf32>
    %335 = tpu.matmul %333, %334, %cst_133 {dimension_numbers = #tpu.dot_dimension_numbers<[1], [0], [0], [1], [0, 0, 1, 1], [], []>} : vector<4x16xbf16>, vector<16x8xbf16>, vector<4x8xf32> -> vector<4x8xf32>
    %336 = arith.addf %227, %335 : vector<4x8xf32>
    %c0_134 = arith.constant 0 : index
    %c0_135 = arith.constant 0 : index
    %337 = vector.load %arg9[%c0_134, %c0_135] : memref<4x8xf32, #tpu.memory_space<vmem>>, vector<4x8xf32>
    %338 = arith.addf %336, %337 : vector<4x8xf32>
    %cst_136 = arith.constant 0.000000e+00 : f32
    %339 = vector.broadcast %cst_136 : f32 to vector<4x8xf32>
    %340 = arith.cmpf oge, %338, %339 : vector<4x8xf32>
    %cst_137 = arith.constant 2.000000e-01 : f32
    %341 = vector.broadcast %cst_137 : f32 to vector<4x8xf32>
    %342 = arith.mulf %341, %338 : vector<4x8xf32>
    %343 = arith.select %340, %338, %342 : vector<4x8xi1>, vector<4x8xf32>
    %344 = tpu.concatenate %231, %343 in 1 : vector<4x48xf32>, vector<4x8xf32> -> vector<4x56xf32>
    %345 = arith.truncf %344 : vector<4x56xf32> to vector<4x56xbf16>
    %c0_138 = arith.constant 0 : index
    %c0_139 = arith.constant 0 : index
    %346 = vector.load %arg10[%c0_138, %c0_139] : memref<56x3xbf16, #tpu.memory_space<vmem>>, vector<56x3xbf16>
    %cst_140 = arith.constant dense<0.000000e+00> : vector<4x3xf32>
    %347 = tpu.matmul %345, %346, %cst_140 {dimension_numbers = #tpu.dot_dimension_numbers<[1], [0], [0], [1], [0, 0, 1, 1], [], []>} : vector<4x56xbf16>, vector<56x3xbf16>, vector<4x3xf32> -> vector<4x3xf32>
    %348 = vector.shape_cast %347 : vector<4x3xf32> to vector<4x1x3xf32>
    %349 = vector.shape_cast %348 : vector<4x1x3xf32> to vector<4x1x3xf32>
    %350 = vector.broadcast %349 : vector<4x1x3xf32> to vector<4x4x3xf32>
    %351 = vector.shape_cast %350 : vector<4x4x3xf32> to vector<16x3xf32>
    %352 = vector.shape_cast %344 : vector<4x56xf32> to vector<4x1x56xf32>
    %353 = vector.shape_cast %352 : vector<4x1x56xf32> to vector<4x1x56xf32>
    %354 = vector.broadcast %353 : vector<4x1x56xf32> to vector<4x4x56xf32>
    %355 = vector.shape_cast %354 : vector<4x4x56xf32> to vector<16x56xf32>
    %356 = vector.extract_strided_slice %355 {offsets = [0, 48], sizes = [16, 8], strides = [1, 1]} : vector<16x56xf32> to vector<16x8xf32>
    %357 = vector.extract_strided_slice %356 {offsets = [0, 0], sizes = [16, 1], strides = [1, 1]} : vector<16x8xf32> to vector<16x1xf32>
    %c0_141 = arith.constant 0 : index
    %c0_142 = arith.constant 0 : index
    %c0_143 = arith.constant 0 : index
    %358 = vector.load %arg11[%c0_141, %c0_142, %c0_143] : memref<8x16x8xf32, #tpu.memory_space<vmem>>, vector<1x16x8xf32>
    %359 = vector.shape_cast %358 : vector<1x16x8xf32> to vector<16x8xf32>
    %360 = vector.broadcast %357 : vector<16x1xf32> to vector<16x8xf32>
    %361 = arith.mulf %360, %359 : vector<16x8xf32>
    %362 = vector.extract_strided_slice %356 {offsets = [0, 1], sizes = [16, 1], strides = [1, 1]} : vector<16x8xf32> to vector<16x1xf32>
    %c1_144 = arith.constant 1 : index
    %c0_145 = arith.constant 0 : index
    %c0_146 = arith.constant 0 : index
    %363 = vector.load %arg11[%c1_144, %c0_145, %c0_146] : memref<8x16x8xf32, #tpu.memory_space<vmem>>, vector<1x16x8xf32>
    %364 = vector.shape_cast %363 : vector<1x16x8xf32> to vector<16x8xf32>
    %365 = vector.broadcast %362 : vector<16x1xf32> to vector<16x8xf32>
    %366 = arith.mulf %365, %364 : vector<16x8xf32>
    %367 = arith.addf %361, %366 : vector<16x8xf32>
    %368 = vector.extract_strided_slice %356 {offsets = [0, 2], sizes = [16, 1], strides = [1, 1]} : vector<16x8xf32> to vector<16x1xf32>
    %c2_147 = arith.constant 2 : index
    %c0_148 = arith.constant 0 : index
    %c0_149 = arith.constant 0 : index
    %369 = vector.load %arg11[%c2_147, %c0_148, %c0_149] : memref<8x16x8xf32, #tpu.memory_space<vmem>>, vector<1x16x8xf32>
    %370 = vector.shape_cast %369 : vector<1x16x8xf32> to vector<16x8xf32>
    %371 = vector.broadcast %368 : vector<16x1xf32> to vector<16x8xf32>
    %372 = arith.mulf %371, %370 : vector<16x8xf32>
    %373 = arith.addf %367, %372 : vector<16x8xf32>
    %374 = vector.extract_strided_slice %356 {offsets = [0, 3], sizes = [16, 1], strides = [1, 1]} : vector<16x8xf32> to vector<16x1xf32>
    %c3_150 = arith.constant 3 : index
    %c0_151 = arith.constant 0 : index
    %c0_152 = arith.constant 0 : index
    %375 = vector.load %arg11[%c3_150, %c0_151, %c0_152] : memref<8x16x8xf32, #tpu.memory_space<vmem>>, vector<1x16x8xf32>
    %376 = vector.shape_cast %375 : vector<1x16x8xf32> to vector<16x8xf32>
    %377 = vector.broadcast %374 : vector<16x1xf32> to vector<16x8xf32>
    %378 = arith.mulf %377, %376 : vector<16x8xf32>
    %379 = arith.addf %373, %378 : vector<16x8xf32>
    %380 = vector.extract_strided_slice %356 {offsets = [0, 4], sizes = [16, 1], strides = [1, 1]} : vector<16x8xf32> to vector<16x1xf32>
    %c4_153 = arith.constant 4 : index
    %c0_154 = arith.constant 0 : index
    %c0_155 = arith.constant 0 : index
    %381 = vector.load %arg11[%c4_153, %c0_154, %c0_155] : memref<8x16x8xf32, #tpu.memory_space<vmem>>, vector<1x16x8xf32>
    %382 = vector.shape_cast %381 : vector<1x16x8xf32> to vector<16x8xf32>
    %383 = vector.broadcast %380 : vector<16x1xf32> to vector<16x8xf32>
    %384 = arith.mulf %383, %382 : vector<16x8xf32>
    %385 = arith.addf %379, %384 : vector<16x8xf32>
    %386 = vector.extract_strided_slice %356 {offsets = [0, 5], sizes = [16, 1], strides = [1, 1]} : vector<16x8xf32> to vector<16x1xf32>
    %c5_156 = arith.constant 5 : index
    %c0_157 = arith.constant 0 : index
    %c0_158 = arith.constant 0 : index
    %387 = vector.load %arg11[%c5_156, %c0_157, %c0_158] : memref<8x16x8xf32, #tpu.memory_space<vmem>>, vector<1x16x8xf32>
    %388 = vector.shape_cast %387 : vector<1x16x8xf32> to vector<16x8xf32>
    %389 = vector.broadcast %386 : vector<16x1xf32> to vector<16x8xf32>
    %390 = arith.mulf %389, %388 : vector<16x8xf32>
    %391 = arith.addf %385, %390 : vector<16x8xf32>
    %392 = vector.extract_strided_slice %356 {offsets = [0, 6], sizes = [16, 1], strides = [1, 1]} : vector<16x8xf32> to vector<16x1xf32>
    %c6_159 = arith.constant 6 : index
    %c0_160 = arith.constant 0 : index
    %c0_161 = arith.constant 0 : index
    %393 = vector.load %arg11[%c6_159, %c0_160, %c0_161] : memref<8x16x8xf32, #tpu.memory_space<vmem>>, vector<1x16x8xf32>
    %394 = vector.shape_cast %393 : vector<1x16x8xf32> to vector<16x8xf32>
    %395 = vector.broadcast %392 : vector<16x1xf32> to vector<16x8xf32>
    %396 = arith.mulf %395, %394 : vector<16x8xf32>
    %397 = arith.addf %391, %396 : vector<16x8xf32>
    %398 = vector.extract_strided_slice %356 {offsets = [0, 7], sizes = [16, 1], strides = [1, 1]} : vector<16x8xf32> to vector<16x1xf32>
    %c7_162 = arith.constant 7 : index
    %c0_163 = arith.constant 0 : index
    %c0_164 = arith.constant 0 : index
    %399 = vector.load %arg11[%c7_162, %c0_163, %c0_164] : memref<8x16x8xf32, #tpu.memory_space<vmem>>, vector<1x16x8xf32>
    %400 = vector.shape_cast %399 : vector<1x16x8xf32> to vector<16x8xf32>
    %401 = vector.broadcast %398 : vector<16x1xf32> to vector<16x8xf32>
    %402 = arith.mulf %401, %400 : vector<16x8xf32>
    %403 = arith.addf %397, %402 : vector<16x8xf32>
    %cst_165 = arith.constant 0.000000e+00 : f32
    %404 = vector.broadcast %cst_165 : f32 to vector<16x8xf32>
    %405 = arith.cmpf oge, %403, %404 : vector<16x8xf32>
    %cst_166 = arith.constant 2.000000e-01 : f32
    %406 = vector.broadcast %cst_166 : f32 to vector<16x8xf32>
    %407 = arith.mulf %406, %403 : vector<16x8xf32>
    %408 = arith.select %405, %403, %407 : vector<16x8xi1>, vector<16x8xf32>
    %409 = arith.truncf %408 : vector<16x8xf32> to vector<16x8xbf16>
    %c0_167 = arith.constant 0 : index
    %c0_168 = arith.constant 0 : index
    %410 = vector.load %arg12[%c0_167, %c0_168] : memref<8x3xbf16, #tpu.memory_space<vmem>>, vector<8x3xbf16>
    %cst_169 = arith.constant dense<0.000000e+00> : vector<16x3xf32>
    %411 = tpu.matmul %409, %410, %cst_169 {dimension_numbers = #tpu.dot_dimension_numbers<[1], [0], [0], [1], [0, 0, 1, 1], [], []>} : vector<16x8xbf16>, vector<8x3xbf16>, vector<16x3xf32> -> vector<16x3xf32>
    %412 = arith.addf %351, %411 : vector<16x3xf32>
    %cst_170 = arith.constant 0.000000e+00 : f32
    %413 = vector.broadcast %cst_170 : f32 to vector<16x125xf32>
    %414 = tpu.concatenate %412, %413 in 1 : vector<16x3xf32>, vector<16x125xf32> -> vector<16x128xf32>
    %c0_171 = arith.constant 0 : index
    %c0_172 = arith.constant 0 : index
    %c0_173 = arith.constant 0 : index
    %415 = vector.load %arg13[%c0_171, %c0_172, %c0_173] : memref<1x16x128xf32, #tpu.memory_space<vmem>>, vector<1x16x128xf32>
    %416 = vector.shape_cast %415 : vector<1x16x128xf32> to vector<16x128xf32>
    %417 = vector.shape_cast %414 : vector<16x128xf32> to vector<1x16x128xf32>
    tpu.vector_store %arg13[%c0_171, %c0_172, %c0_173], %417 {strides = array<i32>} : memref<1x16x128xf32, #tpu.memory_space<vmem>>, vector<1x16x128xf32>,
    return
  }
  func.func @transform_0(%arg0: i32) -> (i32, i32, i32) {
    %c0_i32 = arith.constant 0 : i32
    %c0_i32_0 = arith.constant 0 : i32
    %c0_i32_1 = arith.constant 0 : i32
    return %arg0, %c0_i32, %c0_i32_0 : i32, i32, i32
  }
  func.func @transform_1(%arg0: i32) -> (i32, i32) {
    %c0_i32 = arith.constant 0 : i32
    %c0_i32_0 = arith.constant 0 : i32
    %c0_i32_1 = arith.constant 0 : i32
    return %c0_i32, %c0_i32_0 : i32, i32
  }
  func.func @transform_2(%arg0: i32) -> (i32, i32, i32) {
    %c0_i32 = arith.constant 0 : i32
    %c0_i32_0 = arith.constant 0 : i32
    %c0_i32_1 = arith.constant 0 : i32
    %c0_i32_2 = arith.constant 0 : i32
    return %c0_i32, %c0_i32_0, %c0_i32_1 : i32, i32, i32
  }
  func.func @transform_3(%arg0: i32) -> (i32, i32) {
    %c0_i32 = arith.constant 0 : i32
    %c0_i32_0 = arith.constant 0 : i32
    %c0_i32_1 = arith.constant 0 : i32
    return %c0_i32, %c0_i32_0 : i32, i32
  }
  func.func @transform_4(%arg0: i32) -> (i32, i32) {
    %c0_i32 = arith.constant 0 : i32
    %c0_i32_0 = arith.constant 0 : i32
    %c0_i32_1 = arith.constant 0 : i32
    return %c0_i32, %c0_i32_0 : i32, i32
  }
  func.func @transform_5(%arg0: i32) -> (i32, i32) {
    %c0_i32 = arith.constant 0 : i32
    %c0_i32_0 = arith.constant 0 : i32
    %c0_i32_1 = arith.constant 0 : i32
    return %c0_i32, %c0_i32_0 : i32, i32
  }
  func.func @transform_6(%arg0: i32) -> (i32, i32, i32) {
    %c0_i32 = arith.constant 0 : i32
    %c0_i32_0 = arith.constant 0 : i32
    %c0_i32_1 = arith.constant 0 : i32
    %c0_i32_2 = arith.constant 0 : i32
    return %c0_i32, %c0_i32_0, %c0_i32_1 : i32, i32, i32
  }
  func.func @transform_7(%arg0: i32) -> (i32, i32) {
    %c0_i32 = arith.constant 0 : i32
    %c0_i32_0 = arith.constant 0 : i32
    %c0_i32_1 = arith.constant 0 : i32
    return %c0_i32, %c0_i32_0 : i32, i32
  }
  func.func @transform_8(%arg0: i32) -> (i32, i32) {
    %c0_i32 = arith.constant 0 : i32
    %c0_i32_0 = arith.constant 0 : i32
    %c0_i32_1 = arith.constant 0 : i32
    return %c0_i32, %c0_i32_0 : i32, i32
  }
  func.func @transform_9(%arg0: i32) -> (i32, i32) {
    %c0_i32 = arith.constant 0 : i32
    %c0_i32_0 = arith.constant 0 : i32
    %c0_i32_1 = arith.constant 0 : i32
    return %c0_i32, %c0_i32_0 : i32, i32
  }
  func.func @transform_10(%arg0: i32) -> (i32, i32, i32) {
    %c0_i32 = arith.constant 0 : i32
    %c0_i32_0 = arith.constant 0 : i32
    %c0_i32_1 = arith.constant 0 : i32
    %c0_i32_2 = arith.constant 0 : i32
    return %c0_i32, %c0_i32_0, %c0_i32_1 : i32, i32, i32
  }
  func.func @transform_11(%arg0: i32) -> (i32, i32) {
    %c0_i32 = arith.constant 0 : i32
    %c0_i32_0 = arith.constant 0 : i32
    %c0_i32_1 = arith.constant 0 : i32
    return %c0_i32, %c0_i32_0 : i32, i32
  }
  func.func @transform_12(%arg0: i32) -> (i32, i32, i32) {
    %c0_i32 = arith.constant 0 : i32
    %c0_i32_0 = arith.constant 0 : i32
    %c0_i32_1 = arith.constant 0 : i32
    return %arg0, %c0_i32, %c0_i32_0 : i32, i32, i32
  }
}

</mosaic_0001>

<bundles_post_ra>
// kernel: _lambda_.1
= control target key start
LH: loop header
LB: loop body
LE: loop exit
PB: predicated region body
PF: predicated region fallthrough
CT: control target
= control target key end

     0   :  { %s2984_s21 = smov 0   ;;  %s3589_s0 = inlined_call_operand.vmem [shape: f32[2,1,32], index: 0, kind: input, shape index: {}]   ;;  %s3590_s1 = inlined_call_operand.vmem [shape: bf16[32,16], index: 1, kind: input, shape index: {}]   ;;  %s3591_s2 = inlined_call_operand.vmem [shape: f32[32,2,32], index: 2, kind: input, shape index: {}]   ;;  %s3592_s3 = inlined_call_operand.vmem [shape: bf16[32,16], index: 3, kind: input, shape index: {}]   ;;  %s3593_s4 = inlined_call_operand.vmem [shape: f32[2,16], index: 4, kind: input, shape index: {}]   ;;  %s3594_s5 = inlined_call_operand.vmem [shape: bf16[48,8], index: 5, kind: input, shape index: {}]   ;;  %s3595_s6 = inlined_call_operand.vmem [shape: f32[16,4,16], index: 6, kind: input, shape index: {}]   ;;  %s3596_s7 = inlined_call_operand.vmem [shape: bf16[16,8], index: 7, kind: input, shape index: {}]   ;;  %s3597_s8 = inlined_call_operand.vmem [shape: f32[4,8], index: 8, kind: input, shape index: {}]   ;;  %s3598_s9 = inlined_call_operand.vmem [shape: bf16[56,3], index: 9, kind: input, shape index: {}]   ;;  %s3599_s10 = inlined_call_operand.vmem [shape: f32[8,16,8], index: 10, kind: input, shape index: {}]   ;;  %s3600_s11 = inlined_call_operand.vmem [shape: bf16[8,3], index: 11, kind: input, shape index: {}]   ;;  %s3601_s12 = inlined_call_operand.vmem [shape: f32[2,16,128], index: 12, kind: output, shape index: {}]  }
   0x1 LB: > { %s2480_s22 = sadd.s32 4294967295, %s2853_s21   ;;  %p2484_p0 = scmp.ge.s32.totalorder %s2853_s21, 1  ;;  %s2853_s21 = sphi %s2984_s21, %s22_s21  }
   0x2   : > { %p360_p1 = scmp.lt.s32.totalorder %s2853_s21, 3 }
   0x4   : > { %p361_p2 = pnand %p2484_p0, %p360_p1 }
   0x5   : > { %p400_p3 = scmp.lt.s32.totalorder (!%p361_p2), %s2480_s22, 1  ;;  %s2891_s26 = smov (!%p361_p2), 32  }
   0x6   : > { %364 = sbr.rel (%p361_p2) target bundleno = 1577 (0x629), region = 68  ;;  %s2911_s23 = smov (!%p361_p2), 48  }
   0xb   : > { %v471_v0 = vlaneseq  ;;  %v2855_v1 = vmov 2   ;;  %v2856_v2 = vmov 0   ;;  %s3603_s22 = smov (!%p400_p3, %s2480_s22), 1  ;;  %v2857_v7 = vmov 3   ;;  %v2819_v34 = vld [vmem:[%s3590_s1 + $0x8] sm:$0xff]   ;;  %v2820_v37 = vld [vmem:[%s3590_s1] sm:$0xff]  }
   0xc   : > { %2728 = vset.pattern.permute.xlu1 %v2855_v1  ;;  %2726 = vset.pattern.permute.xlu0 %v2856_v2  ;;  %s402_s25 = scalar_lea.vmem %s3589_s0, %s3603_s22  ;;  %v2858_v8 = vmov 1   ;;  %v2859_v9 = vmov 4   ;;  %v2860_v10 = vmov 5   ;;  %v2861_v11 = vmov 6   ;;  %v2821_v40 = vld [vmem:[%s3592_s3 + $0x8] sm:$0xff]   ;;  %v2822_v42 = vld [vmem:[%s3592_s3] sm:$0xff]  }
   0xd   : > { %v2994_v3 = vshrl.u32 %v471_v0, 7  ;;  %v3003_v5 = vld [vmem:[%s402_s25] sm:$0x1]  ;;  %v2862_v12 = vmov 8   ;;  %v2863_v13 = vmov 7   ;;  %v2864_v14 = vmov 11  }
   0xe   : > { %v2865_v15 = vmov 9   ;;  %v2866_v16 = vmov 14   ;;  %v2867_v17 = vmov 10   ;;  %v2868_v18 = vmov 17   ;;  %v481_v45 = vld [vmem:[%s3591_s2] sm:$0x3] }
   0xf   : > { %v3001_v4 = vsub.s32 0, %v2994_v3  ;;  %v2869_v19 = vmov 12   ;;  %v2870_v20 = vmov 20   ;;  %v2871_v21 = vmov 13   ;;  %v2490_v46 = vld [vmem:[%s3591_s2 + $0x2] sm:$0x3] }
  0x10   : > { %v2872_v22 = vmov 23   ;;  %v2873_v23 = vmov 15   ;;  %v2874_v24 = vmov 26   ;;  %v2875_v25 = vmov 16   ;;  %v2491_v48 = vld [vmem:[%s3591_s2 + $0x4] sm:$0x3] }
  0x11   : > { %v3007_v6 = vrot.slane %v3003_v5, %v3001_v4  ;;  %v2876_v26 = vmov 29   ;;  %v2877_v27 = vmov 18   ;;  %v2878_v28 = vmov 19   ;;  %v2492_v52 = vld [vmem:[%s3591_s2 + $0x6] sm:$0x3] }
  0x12   : > { %v2879_v29 = vmov 21   ;;  %v2880_v30 = vmov 22   ;;  %v2881_v31 = vmov 24   ;;  %v2882_v32 = vmov 25   ;;  %v2493_v55 = vld [vmem:[%s3591_s2 + $0x8] sm:$0x3] }
  0x13   : > { %498 = vperm.xlu1 %2728, %v3007_v6   ;;  %483 = vperm.xlu0 %2726, %v3007_v6   ;;  %v2883_v33 = vmov 27   ;;  %v2884_v35 = vmov 28   ;;  %v2885_v36 = vmov 0.0   ;;  %v2886_v38 = vmov 30   ;;  %v2494_v59 = vld [vmem:[%s3591_s2 + $0xa] sm:$0x3] }
  0x14   : > { %2604 = vmatprep.subr.bf16.mxu0 %v2885_v36  ;;  %2612 = vmatprep.subr.bf16.mxu1 %v2885_v36  ;;  %v410_v39 = vpack.c.bf16 %v3003_v5, %v3003_v5  ;;  %vm2887_vm0 = vmmov 0   ;;  %vm427_vm1 = vcmask 261120   ;;  %v2888_v41 = vmov 31   ;;  %v2495_v1 = vld [vmem:[%s3591_s2 + $0xc] sm:$0x3] }
  0x15   : > { %2605 = vmatpush3.bf16.msra.mxu0 %v2819_v34  ;;  %2608 = vmatprep.mubr.msk.bf16.mxu0 %vm2887_vm0, %v2885_v36  ;;  %v2503_v34 = vld [vmem:[%s3591_s2 + $0x1c] sm:$0x3]  ;;  %vm834_vm4 = vcmask 392192   ;;  %vm1589_vm7 = vcmask 130048   ;;  %vm1722_vm8 = vcmask 1043456   ;;  %vm1718_vm11 = vcmask 457728  }
  0x16   : > { %2606 = vmatprep.subr.bf16.mxu0 %v2885_v36  ;;  %2616 = vmatprep.mubr.msk.bf16.mxu1 %vm2887_vm0, %v2885_v36 }
  0x17   : > { %2729 = vset.pattern.permute.xlu1 %v2857_v7  ;;  %2727 = vset.pattern.permute.xlu0 %v2858_v8  ;;  %v2496_v8 = vld [vmem:[%s3591_s2 + $0xe] sm:$0x3] }
  0x18   : > { %506 = vperm.xlu1 %2729, %v3007_v6   ;;  %490 = vperm.xlu0 %2727, %v3007_v6  }
  0x19   : > { %2607 = vmatpush3.bf16.msra.mxu0 %v2820_v37  ;;  %2613 = vmatpush3.bf16.msra.mxu1 %v2821_v40 }
  0x1a   : > { %2620 = vmatprep.subr.bf16.mxu0 %v2885_v36  ;;  %2614 = vmatprep.subr.bf16.mxu1 %v2885_v36 }
  0x1c   : > { %2730 = vset.pattern.permute.xlu1 %v2859_v9  ;;  %2731 = vset.pattern.permute.xlu0 %v2860_v10  ;;  %v2497_v10 = vld [vmem:[%s3591_s2 + $0x10] sm:$0x3] }
  0x1d   : > { %514 = vperm.xlu1 %2730, %v3007_v6   ;;  %522 = vperm.xlu0 %2731, %v3007_v6  }
  0x1e   : > { %2609 = vmatmul.mubr.msk.bf16.vlgmr.msra.gmra.mxu0 %vm427_vm1, %v410_v39  ;;  %2615 = vmatpush3.bf16.msra.mxu1 %v2822_v42 }
  0x1f   : > { %2626 = vmatprep.mubr.msk.bf16.mxu0 %vm2887_vm0, %v2885_v36  ;;  %2630 = vmatprep.subr.bf16.mxu1 %v2885_v36 }
  0x21   : > { %2732 = vset.pattern.permute.xlu1 %v2861_v11  ;;  %2734 = vset.pattern.permute.xlu0 %v2862_v12 }
  0x22   : > { %530 = vperm.xlu1 %2732, %v3007_v6   ;;  %546 = vperm.xlu0 %2734, %v3007_v6  }
  0x26   : > { %2733 = vset.pattern.permute.xlu1 %v2863_v13  ;;  %2737 = vset.pattern.permute.xlu0 %v2864_v14 }
  0x27   : > { %538 = vperm.xlu1 %2733, %v3007_v6   ;;  %570 = vperm.xlu0 %2737, %v3007_v6  }
  0x2b   : > { %2735 = vset.pattern.permute.xlu1 %v2865_v15  ;;  %2740 = vset.pattern.permute.xlu0 %v2866_v16  ;;  %v2498_v16 = vld [vmem:[%s3591_s2 + $0x12] sm:$0x3] }
  0x2c   : > { %554 = vperm.xlu1 %2735, %v3007_v6   ;;  %594 = vperm.xlu0 %2740, %v3007_v6  }
  0x30   : > { %2736 = vset.pattern.permute.xlu1 %v2867_v17  ;;  %2743 = vset.pattern.permute.xlu0 %v2868_v18 }
  0x31   : > { %562 = vperm.xlu1 %2736, %v3007_v6   ;;  %618 = vperm.xlu0 %2743, %v3007_v6  }
  0x35   : > { %2738 = vset.pattern.permute.xlu1 %v2869_v19  ;;  %2746 = vset.pattern.permute.xlu0 %v2870_v20  ;;  %v2499_v20 = vld [vmem:[%s3591_s2 + $0x14] sm:$0x3] }
  0x36   : > { %578 = vperm.xlu1 %2738, %v3007_v6   ;;  %642 = vperm.xlu0 %2746, %v3007_v6  }
  0x3a   : > { %2739 = vset.pattern.permute.xlu1 %v2871_v21  ;;  %2749 = vset.pattern.permute.xlu0 %v2872_v22  ;;  %v2500_v22 = vld [vmem:[%s3591_s2 + $0x16] sm:$0x3] }
  0x3b   : > { %586 = vperm.xlu1 %2739, %v3007_v6   ;;  %666 = vperm.xlu0 %2749, %v3007_v6  }
  0x3f   : > { %2741 = vset.pattern.permute.xlu1 %v2873_v23  ;;  %2752 = vset.pattern.permute.xlu0 %v2874_v24 }
  0x40   : > { %602 = vperm.xlu1 %2741, %v3007_v6   ;;  %690 = vperm.xlu0 %2752, %v3007_v6  }
  0x44   : > { %2742 = vset.pattern.permute.xlu1 %v2875_v25  ;;  %2755 = vset.pattern.permute.xlu0 %v2876_v26 }
  0x45   : > { %610 = vperm.xlu1 %2742, %v3007_v6   ;;  %714 = vperm.xlu0 %2755, %v3007_v6  }
  0x49   : > { %2744 = vset.pattern.permute.xlu1 %v2877_v27 }
  0x4a   : > { %626 = vperm.xlu1 %2744, %v3007_v6  }
  0x4e   : > { %2745 = vset.pattern.permute.xlu1 %v2878_v28  ;;  %v2501_v28 = vld [vmem:[%s3591_s2 + $0x18] sm:$0x3] }
  0x4f   : > { %634 = vperm.xlu1 %2745, %v3007_v6  }
  0x53   : > { %2747 = vset.pattern.permute.xlu1 %v2879_v29 }
  0x54   : > { %650 = vperm.xlu1 %2747, %v3007_v6  }
  0x58   : > { %2748 = vset.pattern.permute.xlu1 %v2880_v30 }
  0x59   : > { %658 = vperm.xlu1 %2748, %v3007_v6  }
  0x5d   : > { %2750 = vset.pattern.permute.xlu1 %v2881_v31 }
  0x5e   : > { %674 = vperm.xlu1 %2750, %v3007_v6  }
  0x62   : > { %2751 = vset.pattern.permute.xlu1 %v2882_v32  ;;  %v2502_v32 = vld [vmem:[%s3591_s2 + $0x1a] sm:$0x3] }
  0x63   : > { %682 = vperm.xlu1 %2751, %v3007_v6  }
  0x67   : > { %2753 = vset.pattern.permute.xlu1 %v2883_v33 }
  0x68   : > { %698 = vperm.xlu1 %2753, %v3007_v6  }
  0x6c   : > { %2754 = vset.pattern.permute.xlu1 %v2884_v35 }
  0x6d   : > { %706 = vperm.xlu1 %2754, %v3007_v6  }
  0x71   : > { %2756 = vset.pattern.permute.xlu1 %v2886_v38 }
  0x72   : > { %722 = vperm.xlu1 %2756, %v3007_v6  }
  0x76   : > { %2757 = vset.pattern.permute.xlu1 %v2888_v41  ;;  %v2504_v41 = vld [vmem:[%s3591_s2 + $0x1e] sm:$0x3] }
  0x77   : > { %730 = vperm.xlu1 %2757, %v3007_v6  }
  0x8e   : > { %v499_v43 = vpop.permute.xlu1 %498  ;;  %v484_v44 = vpop.permute.xlu0 %483 }
  0x8f   : > { %v486_v47 = vmul.f32 %v484_v44, %v481_v45  ;;  %v501_v53 = vmul.f32 %v2491_v48, %v499_v43  ;;  %v2505_v45 = vld [vmem:[%s3591_s2 + $0x20] sm:$0x3] }
  0x93   : > { %v507_v49 = vpop.permute.xlu1 %506  ;;  %v491_v50 = vpop.permute.xlu0 %490 }
  0x94   : > { %v493_v51 = vmul.f32 %v2490_v46, %v491_v50  ;;  %v509_v56 = vmul.f32 %v2492_v52, %v507_v49 }
  0x96   : > { %v494_v54 = vadd.f32 %v493_v51, %v486_v47  ;;  %v2506_v47 = vld [vmem:[%s3591_s2 + $0x22] sm:$0x3] }
  0x98   : > { %v502_v57 = vadd.f32 %v501_v53, %v494_v54  ;;  %v515_v58 = vpop.permute.xlu1 %514  ;;  %v523_v60 = vpop.permute.xlu0 %522  ;;  %v2507_v53 = vld [vmem:[%s3591_s2 + $0x24] sm:$0x3] }
  0x99   : > { %v517_v61 = vmul.f32 %v2493_v55, %v515_v58  ;;  %v525_v63 = vmul.f32 %v2494_v59, %v523_v60  ;;  %v2509_v59 = vld [vmem:[%s3591_s2 + $0x28] sm:$0x3] }
  0x9a   : > { %v510_v62 = vadd.f32 %v509_v56, %v502_v57  ;;  %v2508_v57 = vld [vmem:[%s3591_s2 + $0x26] sm:$0x3] }
  0x9c   : > { %v518_v0 = vadd.f32 %v517_v61, %v510_v62 }
  0x9d   : > { %v531_v2 = vpop.permute.xlu1 %530  ;;  %v547_v11 = vpop.permute.xlu0 %546 }
  0x9e   : > { %v526_v5 = vadd.f32 %v525_v63, %v518_v0  ;;  %v533_v7 = vmul.f32 %v2495_v1, %v531_v2  ;;  %v549_v15 = vmul.f32 %v2497_v10, %v547_v11  ;;  %v2510_v1 = vld [vmem:[%s3591_s2 + $0x2a] sm:$0x3]  ;;  %v2512_v10 = vld [vmem:[%s3591_s2 + $0x2e] sm:$0x3] }
  0xa0   : > { %v534_v12 = vadd.f32 %v533_v7, %v526_v5 }
  0xa2   : > { %v539_v9 = vpop.permute.xlu1 %538  ;;  %v571_v23 = vpop.permute.xlu0 %570 }
  0xa3   : > { %v541_v13 = vmul.f32 %v2496_v8, %v539_v9  ;;  %v573_v27 = vmul.f32 %v2500_v22, %v571_v23  ;;  %v2511_v8 = vld [vmem:[%s3591_s2 + $0x2c] sm:$0x3]  ;;  %v2515_v22 = vld [vmem:[%s3591_s2 + $0x34] sm:$0x3] }
  0xa5   : > { %v542_v14 = vadd.f32 %v541_v13, %v534_v12 }
  0xa7   : > { %v555_v17 = vpop.permute.xlu1 %554  ;;  %v550_v18 = vadd.f32 %v549_v15, %v542_v14  ;;  %v595_v35 = vpop.permute.xlu0 %594 }
  0xa8   : > { %v557_v19 = vmul.f32 %v2498_v16, %v555_v17  ;;  %v597_v40 = vmul.f32 %v2503_v34, %v595_v35  ;;  %v2513_v16 = vld [vmem:[%s3591_s2 + $0x30] sm:$0x3]  ;;  %v2518_v34 = vld [vmem:[%s3591_s2 + $0x3a] sm:$0x3] }
  0xaa   : > { %v558_v24 = vadd.f32 %v557_v19, %v550_v18 }
  0xac   : > { %v563_v21 = vpop.permute.xlu1 %562  ;;  %v619_v48 = vpop.permute.xlu0 %618 }
  0xad   : > { %v565_v25 = vmul.f32 %v2499_v20, %v563_v21  ;;  %v621_v52 = vmul.f32 %v2506_v47, %v619_v48  ;;  %v2514_v20 = vld [vmem:[%s3591_s2 + $0x32] sm:$0x3] }
  0xaf   : > { %v566_v26 = vadd.f32 %v565_v25, %v558_v24 }
  0xb1   : > { %v579_v29 = vpop.permute.xlu1 %578  ;;  %v574_v30 = vadd.f32 %v573_v27, %v566_v26  ;;  %v643_v60 = vpop.permute.xlu0 %642 }
  0xb2   : > { %v581_v31 = vmul.f32 %v2501_v28, %v579_v29  ;;  %v645_v0 = vmul.f32 %v2509_v59, %v643_v60  ;;  %v2516_v28 = vld [vmem:[%s3591_s2 + $0x36] sm:$0x3]  ;;  %v2825_v59 = vld [vmem:[%s3594_s5] sm:$0xff]  }
  0xb4   : > { %v582_v37 = vadd.f32 %v581_v31, %v574_v30 }
  0xb6   : > { %v587_v33 = vpop.permute.xlu1 %586  ;;  %v667_v11 = vpop.permute.xlu0 %666 }
  0xb7   : > { %v589_v38 = vmul.f32 %v2502_v32, %v587_v33  ;;  %v669_v15 = vmul.f32 %v2512_v10, %v667_v11  ;;  %v2517_v32 = vld [vmem:[%s3591_s2 + $0x38] sm:$0x3]  ;;  %v2892_v11 = vmov 1966171168  }
  0xb9   : > { %v590_v39 = vadd.f32 %v589_v38, %v582_v37 }
  0xbb   : > { %v603_v42 = vpop.permute.xlu1 %602  ;;  %v598_v43 = vadd.f32 %v597_v40, %v590_v39  ;;  %v691_v23 = vpop.permute.xlu0 %690 }
  0xbc   : > { %v605_v44 = vmul.f32 %v2504_v41, %v603_v42  ;;  %v693_v27 = vmul.f32 %v2515_v22, %v691_v23  ;;  %v2519_v41 = vld [vmem:[%s3591_s2 + $0x3c] sm:$0x3]  ;;  %v2895_v22 = vmov 40   ;;  %v2896_v23 = vmov 35  }
  0xbe   : > { %v606_v49 = vadd.f32 %v605_v44, %v598_v43 }
  0xc0   : > { %v611_v46 = vpop.permute.xlu1 %610  ;;  %v715_v35 = vpop.permute.xlu0 %714 }
  0xc1   : > { %v613_v50 = vmul.f32 %v2505_v45, %v611_v46  ;;  %v717_v40 = vmul.f32 %v2518_v34, %v715_v35  ;;  %v2520_v45 = vld [vmem:[%s3591_s2 + $0x3e] sm:$0x3]  ;;  %v2904_v34 = vmov 44   ;;  %v2905_v35 = vmov 45  }
  0xc3   : > { %v614_v51 = vadd.f32 %v613_v50, %v606_v49 }
  0xc5   : > { %v627_v54 = vpop.permute.xlu1 %626  ;;  %v622_v55 = vadd.f32 %v621_v52, %v614_v51 }
  0xc6   : > { %v629_v56 = vmul.f32 %v2507_v53, %v627_v54 }
  0xc8   : > { %v630_v61 = vadd.f32 %v629_v56, %v622_v55 }
  0xca   : > { %v635_v58 = vpop.permute.xlu1 %634 }
  0xcb   : > { %v637_v62 = vmul.f32 %v2508_v57, %v635_v58  ;;  %v2823_v57 = vld [vmem:[%s3594_s5 + $0x10] sm:$0xff]   ;;  %v2824_v58 = vld [vmem:[%s3594_s5 + $0x8] sm:$0xff]  }
  0xcc   : > { %2621 = vmatpush3.bf16.msra.mxu0 %v2823_v57 }
  0xcd   : > { %v638_v63 = vadd.f32 %v637_v62, %v630_v61  ;;  %2622 = vmatprep.subr.bf16.mxu0 %v2885_v36  ;;  %v799_v62 = vld [vmem:[%s3593_s4] sm:$0x3] }
  0xcf   : > { %v651_v2 = vpop.permute.xlu1 %650  ;;  %v646_v5 = vadd.f32 %v645_v0, %v638_v63  ;;  %v2889_v0 = vmov 32  }
  0xd0   : > { %v653_v7 = vmul.f32 %v2510_v1, %v651_v2  ;;  %2623 = vmatpush3.bf16.msra.mxu0 %v2824_v58  ;;  %2758 = vset.pattern.permute.xlu1 %v2889_v0  ;;  %v2890_v1 = vmov 34   ;;  %v2530_v58 = vld.sshfl [vmem:[%s3595_s6 + $0x4] sm:$0x33 pattern:$0x76325410] }
  0xd1   : > { %2624 = vmatprep.subr.bf16.mxu0 %v2885_v36  ;;  %2760 = vset.pattern.permute.xlu0 %v2890_v1 }
  0xd2   : > { %v654_v12 = vadd.f32 %v653_v7, %v646_v5 }
  0xd4   : > { %v659_v9 = vpop.permute.xlu1 %658  ;;  %2625 = vmatpush3.bf16.msra.mxu0 %v2825_v59 }
  0xd5   : > { %v661_v13 = vmul.f32 %v2511_v8, %v659_v9  ;;  %2648 = vmatprep.subr.bf16.mxu0 %v2885_v36 }
  0xd7   : > { %v662_v14 = vadd.f32 %v661_v13, %v654_v12  ;;  %v880_v12 = vunpack.c.l.s4 %v2892_v11 }
  0xd9   : > { %v675_v17 = vpop.permute.xlu1 %674  ;;  %v670_v18 = vadd.f32 %v669_v15, %v662_v14  ;;  %v881_v13 = vunpack.c.0.s8 %v880_v12 }
  0xda   : > { %v677_v19 = vmul.f32 %v2513_v16, %v675_v17 }
  0xdb   : > { %v3185_v14 = vsub.s32 %v881_v13, %v2994_v3 }
  0xdc   : > { %v678_v24 = vadd.f32 %v677_v19, %v670_v18 }
  0xde   : > { %v683_v21 = vpop.permute.xlu1 %682  ;;  %v465_v53 = vpop.f32.mrf.mxu0 }
  0xdf   : > { %v685_v25 = vmul.f32 %v2514_v20, %v683_v21  ;;  %v474_v60 = vrot.slane %v465_v53, %v3001_v4  ;;  %v2893_v21 = vmov 37  }
  0xe0   : > { %v2610_v54 = vpop.f32.mrf.mxu0 }
  0xe1   : > { %v686_v26 = vadd.f32 %v685_v25, %v678_v24  ;;  %v2897_v24 = vmov 43   ;;  %v2898_v25 = vmov 36  }
  0xe2   : > { %v468_v55 = vpop.f32.mrf.mxu0 }
  0xe3   : > { %v699_v29 = vpop.permute.xlu1 %698  ;;  %v694_v30 = vadd.f32 %v693_v27, %v686_v26 }
  0xe4   : > { %v701_v31 = vmul.f32 %v2516_v28, %v699_v29  ;;  %v2611_v56 = vpop.f32.mrf.mxu0  ;;  %v2899_v28 = vmov 46   ;;  %v2900_v29 = vmov 38  }
  0xe6   : > { %v702_v37 = vadd.f32 %v701_v31, %v694_v30  ;;  %v2901_v31 = vmov 39  }
  0xe8   : > { %v707_v33 = vpop.permute.xlu1 %706 }
  0xe9   : > { %v709_v38 = vmul.f32 %v2517_v32, %v707_v33  ;;  %v2902_v32 = vmov 41   ;;  %v2903_v33 = vmov 42  }
  0xeb   : > { %v710_v39 = vadd.f32 %v709_v38, %v702_v37  ;;  %v2906_v37 = vmov 47   ;;  %v2826_v38 = vld [vmem:[%s3596_s7] sm:$0xff]  }
  0xed   : > { %v723_v42 = vpop.permute.xlu1 %722  ;;  %v718_v43 = vadd.f32 %v717_v40, %v710_v39 }
  0xee   : > { %v725_v44 = vmul.f32 %v2519_v41, %v723_v42 }
  0xf0   : > { %v726_v47 = vadd.f32 %v725_v44, %v718_v43 }
  0xf2   : > { %v731_v46 = vpop.permute.xlu1 %730 }
  0xf3   : > { %v733_v48 = vmul.f32 %v2520_v45, %v731_v46 }
  0xf5   : > { %v734_v49 = vadd.f32 %v733_v48, %v726_v47 }
  0xf7   : > { %vm735_vm2 = vcmp.ge.f32.partialorder %v734_v49, 0.0  ;;  %v736_v50 = vmul.f32 0.2, %v734_v49 }
  0xf9   : > { %v737_v51 = vsel %vm735_vm2, %v734_v49, %v736_v50 }
  0xfa   : > { %v738_v52 = vpack.c.bf16 %v737_v51, %v737_v51 }
  0xfc   : > { %2617 = vmatmul.mubr.msk.bf16.vlgmr.msra.gmra.mxu1 %vm427_vm1, %v738_v52  ;;  %v2907_v52 = vmov 269488144  }
  0xfd   : > { %2632 = vmatprep.mubr.msk.bf16.mxu1 %vm2887_vm0, %v2885_v36  ;;  %2631 = vmatpush3.bf16.msra.mxu1 %v2826_v38  ;;  %v948_v53 = vunpack.c.l.s4 %v2907_v52 }
  0xfe   : > { %2636 = vmatprep.subr.bf16.mxu1 %v2885_v36 }
  0xff   : > { %v949_v55 = vunpack.c.0.s8 %v948_v53 }
 0x101   : > { %v3259_v57 = vsub.s32 %v949_v55, %v2994_v3 }
 0x1bc   : > { %v792_v61 = vpop.f32.mrf.mxu1 }
 0x1bd   : > { %v798_v63 = vadd.f32 %v792_v61, %v474_v60  ;;  %v1010_v60 = vcombine.high %v2530_v58, %v2530_v58 }
 0x1be   : > { %v2618_v2 = vpop.f32.mrf.mxu1 }
 0x1bf   : > { %v800_v5 = vadd.f32 %v799_v62, %v798_v63  ;;  %v2528_v62 = vld.sshfl [vmem:[%s3595_s6] sm:$0x33 pattern:$0x76325410] }
 0x1c0   : > { %v795_v7 = vpop.f32.mrf.mxu1 }
 0x1c1   : > { %vm801_vm3 = vcmp.ge.f32.partialorder %v800_v5, 0.0  ;;  %v802_v8 = vmul.f32 0.2, %v800_v5 }
 0x1c2   : > { %v2619_v9 = vpop.f32.mrf.mxu1 }
 0x1c3   : > { %v803_v10 = vsel %vm801_vm3, %v800_v5, %v802_v8  ;;  %v2532_v5 = vld.sshfl [vmem:[%s3595_s6 + $0x8] sm:$0x33 pattern:$0x76325410] }
 0x1c4   : > { %805 = vrot.lane.b32.xlu0 %v803_v10, %s2891_s26  ;;  %v1049_v9 = vcombine.high %v2532_v5, %v2532_v5  ;;  %s2584_s26 = sshll.u32 %s3603_s22, 4 }
 0x1c5   : > { %s407_s29 = scalar_lea.vmem %s3601_s12, %s2584_s26 }
 0x236   : > { %v806_v15 = vpop.permute.xlu0 %805 }
 0x237   : > { %v808_v16 = vsel %vm427_vm1, %v3007_v6, %v806_v15  ;;  %v2894_v6 = vmov 33   ;;  %vm2423_vm1 = vcmask 23552  }
 0x238   : > { %v809_v17 = vpack.c.bf16 %v808_v16, %v808_v16  ;;  %v918_v18 = vrot.slane %v808_v16, %v3185_v14 }
 0x23a   : > { %v926_v19 = vrot.slane %v918_v18, %v3185_v14  ;;  %2627 = vmatmul.mubr.msk.bf16.vlgmr.msra.gmra.mxu0 %vm834_vm4, %v809_v17  ;;  %v919_v26 = vcombine.high %v918_v18, %v918_v18  ;;  %v2534_v18 = vld.sshfl [vmem:[%s3595_s6 + $0xc] sm:$0x33 pattern:$0x76325410] }
 0x23b   : > { %2650 = vmatprep.mubr.msk.bf16.mxu0 %vm2887_vm0, %v2885_v36 }
 0x23c   : > { %v3195_v20 = vrot.slane %v926_v19, %v3001_v4  ;;  %v933_v27 = vrot.slane %v919_v26, %v3185_v14  ;;  %v1088_v19 = vcombine.high %v2534_v18, %v2534_v18 }
 0x23e   : > { %1020 = vperm.xlu0 %2760, %v3195_v20   ;;  %944 = vperm.xlu1 %2758, %v3195_v20   ;;  %v3209_v30 = vrot.slane %v933_v27, %v3001_v4 }
 0x242   : > { %2763 = vset.pattern.permute.xlu0 %v2893_v21  ;;  %2759 = vset.pattern.permute.xlu1 %v2894_v6 }
 0x243   : > { %1137 = vperm.xlu0 %2763, %v3195_v20   ;;  %981 = vperm.xlu1 %2759, %v3195_v20  }
 0x247   : > { %2766 = vset.pattern.permute.xlu0 %v2895_v22  ;;  %2761 = vset.pattern.permute.xlu1 %v2896_v23 }
 0x248   : > { %1254 = vperm.xlu0 %2766, %v3195_v20   ;;  %1059 = vperm.xlu1 %2761, %v3195_v20  }
 0x24c   : > { %2769 = vset.pattern.permute.xlu0 %v2897_v24  ;;  %2762 = vset.pattern.permute.xlu1 %v2898_v25 }
 0x24d   : > { %1371 = vperm.xlu0 %2769, %v3195_v20   ;;  %1098 = vperm.xlu1 %2762, %v3195_v20  }
 0x251   : > { %2772 = vset.pattern.permute.xlu0 %v2899_v28  ;;  %2764 = vset.pattern.permute.xlu1 %v2900_v29 }
 0x252   : > { %1488 = vperm.xlu0 %2772, %v3195_v20   ;;  %1176 = vperm.xlu1 %2764, %v3195_v20  }
 0x256   : > { %2773 = vset.pattern.permute.xlu0 %v2889_v0  ;;  %2765 = vset.pattern.permute.xlu1 %v2901_v31 }
 0x257   : > { %1215 = vperm.xlu1 %2765, %v3195_v20   ;;  %955 = vperm.xlu0 %2773, %v3209_v30  }
 0x25b   : > { %2767 = vset.pattern.permute.xlu1 %v2902_v32  ;;  %2776 = vset.pattern.permute.xlu0 %v2896_v23 }
 0x25c   : > { %1293 = vperm.xlu1 %2767, %v3195_v20   ;;  %1070 = vperm.xlu0 %2776, %v3209_v30  }
 0x260   : > { %2768 = vset.pattern.permute.xlu1 %v2903_v33  ;;  %2779 = vset.pattern.permute.xlu0 %v2900_v29 }
 0x261   : > { %1332 = vperm.xlu1 %2768, %v3195_v20   ;;  %1187 = vperm.xlu0 %2779, %v3209_v30  }
 0x265   : > { %2770 = vset.pattern.permute.xlu1 %v2904_v34  ;;  %2782 = vset.pattern.permute.xlu0 %v2902_v32 }
 0x266   : > { %1410 = vperm.xlu1 %2770, %v3195_v20   ;;  %1304 = vperm.xlu0 %2782, %v3209_v30  }
 0x26a   : > { %2771 = vset.pattern.permute.xlu1 %v2905_v35  ;;  %2785 = vset.pattern.permute.xlu0 %v2904_v34  ;;  %v2538_v34 = vld.sshfl [vmem:[%s3595_s6 + $0x14] sm:$0x33 pattern:$0x76325410] }
 0x26b   : > { %1449 = vperm.xlu1 %2771, %v3195_v20   ;;  %1421 = vperm.xlu0 %2785, %v3209_v30  }
 0x26f   : > { %2774 = vset.pattern.permute.xlu1 %v2894_v6  ;;  %2789 = vset.pattern.permute.xlu0 %v2906_v37 }
 0x270   : > { %992 = vperm.xlu1 %2774, %v3209_v30   ;;  %1538 = vperm.xlu0 %2789, %v3209_v30  }
 0x274   : > { %2775 = vset.pattern.permute.xlu1 %v2890_v1  ;;  %v973_v1 = vcombine.high %v2528_v62, %v2528_v62 }
 0x275   : > { %1031 = vperm.xlu1 %2775, %v3209_v30  }
 0x279   : > { %2777 = vset.pattern.permute.xlu1 %v2898_v25  ;;  %v2536_v25 = vld.sshfl [vmem:[%s3595_s6 + $0x10] sm:$0x33 pattern:$0x76325410] }
 0x27a   : > { %1109 = vperm.xlu1 %2777, %v3209_v30   ;;  %v1127_v27 = vcombine.high %v2536_v25, %v2536_v25 }
 0x27e   : > { %2778 = vset.pattern.permute.xlu1 %v2893_v21 }
 0x27f   : > { %1148 = vperm.xlu1 %2778, %v3209_v30  }
 0x283   : > { %2780 = vset.pattern.permute.xlu1 %v2901_v31 }
 0x284   : > { %1226 = vperm.xlu1 %2780, %v3209_v30  }
 0x288   : > { %2781 = vset.pattern.permute.xlu1 %v2895_v22 }
 0x289   : > { %1265 = vperm.xlu1 %2781, %v3209_v30  }
 0x28d   : > { %2783 = vset.pattern.permute.xlu1 %v2903_v33 }
 0x28e   : > { %1343 = vperm.xlu1 %2783, %v3209_v30  }
 0x292   : > { %2784 = vset.pattern.permute.xlu1 %v2897_v24 }
 0x293   : > { %1382 = vperm.xlu1 %2784, %v3209_v30  }
 0x297   : > { %2786 = vset.pattern.permute.xlu1 %v2905_v35 }
 0x298   : > { %1460 = vperm.xlu1 %2786, %v3209_v30  }
 0x29c   : > { %2787 = vset.pattern.permute.xlu1 %v2899_v28 }
 0x29d   : > { %1499 = vperm.xlu1 %2787, %v3209_v30  }
 0x2a1   : > { %2788 = vset.pattern.permute.xlu1 %v2906_v37 }
 0x2a2   : > { %1527 = vperm.xlu1 %2788, %v3195_v20  }
 0x2b9   : > { %v945_v39 = vpop.permute.xlu1 %944  ;;  %v1021_v43 = vpop.permute.xlu0 %1020 }
 0x2ba   : > { %v953_v7 = vrot.slane %v945_v39, %v3259_v57  ;;  %v1029_v16 = vrot.slane %v1021_v43, %v3259_v57 }
 0x2bc   : > { %v976_v17 = vmul.f32 %v2528_v62, %v953_v7  ;;  %v1052_v29 = vmul.f32 %v2532_v5, %v1029_v16  ;;  %v2542_v5 = vld.sshfl [vmem:[%s3595_s6 + $0x1c] sm:$0x33 pattern:$0x76325410] }
 0x2be   : > { %v982_v40 = vpop.permute.xlu1 %981  ;;  %v3240_v45 = vpop.permute.xlu0 %1137 }
 0x2bf   : > { %v990_v63 = vrot.slane %v982_v40, %v3259_v57 }
 0x2c1   : > { %v1013_v10 = vmul.f32 %v2530_v58, %v990_v63 }
 0x2c3   : > { %v1060_v41 = vpop.permute.xlu1 %1059  ;;  %v3246_v48 = vpop.permute.xlu0 %1254  ;;  %v1015_v23 = vadd.f32 %v1013_v10, %v976_v17 }
 0x2c4   : > { %v1068_v24 = vrot.slane %v1060_v41, %v3259_v57  ;;  %v1166_v41 = vcombine.high %v2538_v34, %v2538_v34 }
 0x2c5   : > { %v1054_v35 = vadd.f32 %v1052_v29, %v1015_v23 }
 0x2c6   : > { %v1091_v37 = vmul.f32 %v2534_v18, %v1068_v24 }
 0x2c8   : > { %v1099_v42 = vpop.permute.xlu1 %1098  ;;  %v3250_v50 = vpop.permute.xlu0 %1371  ;;  %v1093_v58 = vadd.f32 %v1091_v37, %v1054_v35 }
 0x2c9   : > { %v1107_v31 = vrot.slane %v1099_v42, %v3259_v57  ;;  %v1146_v42 = vrot.slane %v3240_v45, %v3259_v57 }
 0x2cb   : > { %v1130_v43 = vmul.f32 %v2536_v25, %v1107_v31  ;;  %v1169_v10 = vmul.f32 %v2538_v34, %v1146_v42  ;;  %v2548_v34 = vld.sshfl [vmem:[%s3595_s6 + $0x28] sm:$0x33 pattern:$0x76325410] }
 0x2cd   : > { %v3238_v44 = vpop.permute.xlu1 %1176  ;;  %v3254_v54 = vpop.permute.xlu0 %1488 }
 0x2d2   : > { %v3242_v46 = vpop.permute.xlu1 %1215  ;;  %v956_v59 = vpop.permute.xlu0 %955 }
 0x2d3   : > { %v964_v2 = vrot.slane %v956_v59, %v3259_v57  ;;  %v2540_v59 = vld.sshfl [vmem:[%s3595_s6 + $0x18] sm:$0x33 pattern:$0x76325410] }
 0x2d5   : > { %v977_v13 = vmul.f32 %v973_v1, %v964_v2  ;;  %v1132_v1 = vadd.f32 %v1130_v43, %v1093_v58  ;;  %v1185_v2 = vrot.slane %v3238_v44, %v3259_v57  ;;  %v2544_v44 = vld.sshfl [vmem:[%s3595_s6 + $0x20] sm:$0x33 pattern:$0x76325410] }
 0x2d6   : > { %v2550_v43 = vld.sshfl [vmem:[%s3595_s6 + $0x2c] sm:$0x33 pattern:$0x76325410] }
 0x2d7   : > { %v3244_v47 = vpop.permute.xlu1 %1293  ;;  %v1071_v11 = vpop.permute.xlu0 %1070  ;;  %v1171_v16 = vadd.f32 %v1169_v10, %v1132_v1  ;;  %v1208_v17 = vmul.f32 %v2540_v59, %v1185_v2  ;;  %v1400_v58 = vcombine.high %v2550_v43, %v2550_v43 }
 0x2d8   : > { %v1079_v21 = vrot.slane %v1071_v11, %v3259_v57  ;;  %v1224_v11 = vrot.slane %v3242_v46, %v3259_v57  ;;  %v1263_v46 = vrot.slane %v3246_v48, %v3259_v57  ;;  %v1361_v48 = vcombine.high %v2548_v34, %v2548_v34 }
 0x2d9   : > { %v1210_v25 = vadd.f32 %v1208_v17, %v1171_v16 }
 0x2da   : > { %v1092_v33 = vmul.f32 %v1088_v19, %v1079_v21  ;;  %v1283_v21 = vcombine.high %v2544_v44, %v2544_v44 }
 0x2dc   : > { %v3248_v49 = vpop.permute.xlu1 %1332  ;;  %v1188_v38 = vpop.permute.xlu0 %1187 }
 0x2dd   : > { %v1196_v62 = vrot.slane %v1188_v38, %v3259_v57  ;;  %v1286_v38 = vmul.f32 %v2544_v44, %v1263_v46  ;;  %v2556_v44 = vld.sshfl [vmem:[%s3595_s6 + $0x38] sm:$0x33 pattern:$0x76325410] }
 0x2e1   : > { %v3252_v51 = vpop.permute.xlu1 %1410 }
 0x2e6   : > { %v3256_v56 = vpop.permute.xlu1 %1449 }
 0x2eb   : > { %v993_v61 = vpop.permute.xlu1 %992 }
 0x2ec   : > { %v1001_v0 = vrot.slane %v993_v61, %v3259_v57  ;;  %v1205_v61 = vcombine.high %v2540_v59, %v2540_v59 }
 0x2ee   : > { %v1014_v8 = vmul.f32 %v1010_v60, %v1001_v0 }
 0x2f0   : > { %v1032_v12 = vpop.permute.xlu1 %1031  ;;  %v1016_v6 = vadd.f32 %v1014_v8, %v977_v13  ;;  %v1244_v8 = vcombine.high %v2542_v5, %v2542_v5 }
 0x2f1   : > { %v1040_v15 = vrot.slane %v1032_v12, %v3259_v57 }
 0x2f3   : > { %v1053_v22 = vmul.f32 %v1049_v9, %v1040_v15  ;;  %v1209_v15 = vmul.f32 %v1205_v61, %v1196_v62 }
 0x2f5   : > { %v1055_v26 = vadd.f32 %v1053_v22, %v1016_v6  ;;  %v1110_v28 = vpop.permute.xlu1 %1109  ;;  %v1247_v6 = vmul.f32 %v2542_v5, %v1224_v11  ;;  %v1305_v22 = vpop.permute.xlu0 %1304 }
 0x2f6   : > { %v1118_v32 = vrot.slane %v1110_v28, %v3259_v57  ;;  %v1313_v28 = vrot.slane %v1305_v22, %v3259_v57  ;;  %v1517_v22 = vcombine.high %v2556_v44, %v2556_v44 }
 0x2f7   : > { %v1094_v39 = vadd.f32 %v1092_v33, %v1055_v26  ;;  %v2546_v26 = vld.sshfl [vmem:[%s3595_s6 + $0x24] sm:$0x33 pattern:$0x76325410]  ;;  %v1302_v33 = vrot.slane %v3244_v47, %v3259_v57 }
 0x2f8   : > { %v1131_v40 = vmul.f32 %v1127_v27, %v1118_v32  ;;  %v1322_v27 = vcombine.high %v2546_v26, %v2546_v26  ;;  %v1249_v32 = vadd.f32 %v1247_v6, %v1210_v25 }
 0x2f9   : > { %v1325_v47 = vmul.f32 %v2546_v26, %v1302_v33  ;;  %v1497_v26 = vrot.slane %v3254_v54, %v3259_v57 }
 0x2fa   : > { %v1149_v52 = vpop.permute.xlu1 %1148  ;;  %v3289_v53 = vpop.f32.mrf.mxu0  ;;  %v1133_v63 = vadd.f32 %v1131_v40, %v1094_v39  ;;  %v1341_v39 = vrot.slane %v3248_v49, %v3259_v57  ;;  %v1380_v49 = vrot.slane %v3250_v50, %v3259_v57 }
 0x2fb   : > { %v1157_v55 = vrot.slane %v1149_v52, %v3259_v57  ;;  %v1288_v52 = vadd.f32 %v1286_v38, %v1249_v32  ;;  %v2908_v38 = vmov 1983009808  }
 0x2fc   : > { %v2628_v60 = vpop.f32.mrf.mxu0  ;;  %v1364_v59 = vmul.f32 %v2548_v34, %v1341_v39  ;;  %v1573_v39 = vunpack.c.l.s4 %v2908_v38  ;;  %v2917_v38 = vmov 54  }
 0x2fd   : > { %v1170_v0 = vmul.f32 %v1166_v41, %v1157_v55  ;;  %v1326_v41 = vmul.f32 %v1322_v27, %v1313_v28  ;;  %v1422_v60 = vpop.permute.xlu0 %1421 }
 0x2fe   : > { %v875_v45 = vpop.f32.mrf.mxu0  ;;  %v1430_v2 = vrot.slane %v1422_v60, %v3259_v57 }
 0x2ff   : > { %v1172_v7 = vadd.f32 %v1170_v0, %v1133_v63  ;;  %v1227_v9 = vpop.permute.xlu1 %1226  ;;  %v1327_v63 = vadd.f32 %v1325_v47, %v1288_v52  ;;  %v2552_v0 = vld.sshfl [vmem:[%s3595_s6 + $0x30] sm:$0x33 pattern:$0x76325410]  ;;  %v1574_v47 = vunpack.c.0.s8 %v1573_v39 }
 0x300   : > { %v1235_v12 = vrot.slane %v1227_v9, %v3259_v57  ;;  %v2629_v13 = vpop.f32.mrf.mxu0  ;;  %v1439_v1 = vcombine.high %v2552_v0, %v2552_v0  ;;  %v2554_v9 = vld.sshfl [vmem:[%s3595_s6 + $0x34] sm:$0x33 pattern:$0x76325410] }
 0x301   : > { %v1211_v18 = vadd.f32 %v1209_v15, %v1172_v7  ;;  %v1366_v7 = vadd.f32 %v1364_v59, %v1327_v63  ;;  %v1478_v50 = vcombine.high %v2554_v9, %v2554_v9  ;;  %v1458_v13 = vrot.slane %v3256_v56, %v3259_v57  ;;  %v2829_v63 = vld [vmem:[%s3598_s9 + $0x8] sm:$0xff]  }
 0x302   : > { %v1248_v19 = vmul.f32 %v1244_v8, %v1235_v12  ;;  %v1419_v8 = vrot.slane %v3252_v51, %v3259_v57  ;;  %v1403_v12 = vmul.f32 %v2550_v43, %v1380_v49  ;;  %v1443_v16 = vmul.f32 %v1439_v1, %v1430_v2  ;;  %v2828_v49 = vld [vmem:[%s3598_s9 + $0x10] sm:$0xff]  }
 0x304   : > { %v1266_v23 = vpop.permute.xlu1 %1265  ;;  %v1250_v29 = vadd.f32 %v1248_v19, %v1211_v18  ;;  %v1405_v17 = vadd.f32 %v1403_v12, %v1366_v7  ;;  %v1442_v51 = vmul.f32 %v2552_v0, %v1419_v8  ;;  %v2558_v18 = vld.sshfl [vmem:[%s3595_s6 + $0x3c] sm:$0x33 pattern:$0x76325410]  ;;  %v1539_v19 = vpop.permute.xlu0 %1538  ;;  %v885_v0 = vrot.slane %v3289_v53, %v3185_v14 }
 0x305   : > { %v1274_v24 = vrot.slane %v1266_v23, %v3259_v57  ;;  %v1481_v23 = vmul.f32 %v2554_v9, %v1458_v13  ;;  %v1556_v56 = vcombine.high %v2558_v18, %v2558_v18  ;;  %v1547_v46 = vrot.slane %v1539_v19, %v3259_v57  ;;  %v2561_v7 = vld.sshfl [vmem:[%s3597_s8] sm:$0x33 pattern:$0x76325410] }
 0x306   : > { %v1444_v27 = vadd.f32 %v1442_v51, %v1405_v17  ;;  %v886_v1 = vcombine.high %v885_v0, %v885_v0  ;;  %v893_v2 = vrot.slane %v885_v0, %v3185_v14  ;;  %v1655_v12 = vcombine.high %v2561_v7, %v2561_v7 }
 0x307   : > { %v1287_v31 = vmul.f32 %v1283_v21, %v1274_v24  ;;  %v1560_v32 = vmul.f32 %v1556_v56, %v1547_v46  ;;  %v2909_v19 = vmov 48   ;;  %v1666_v56 = vcombine.low %v3195_v20, %v3209_v30 }
 0x308   : > { %v904_v8 = vrot.slane %v893_v2, %v3001_v4  ;;  %2790 = vset.pattern.permute.xlu1 %v2909_v19  ;;  %v2914_v20 = vmov 53   ;;  %v2915_v30 = vmov 52  }
 0x309   : > { %v1289_v35 = vadd.f32 %v1287_v31, %v1250_v29  ;;  %v1344_v37 = vpop.permute.xlu1 %1343  ;;  %v1483_v31 = vadd.f32 %v1481_v23, %v1444_v27 }
 0x30a   : > { %v1352_v40 = vrot.slane %v1344_v37, %v3259_v57 }
 0x30b   : > { %v1328_v55 = vadd.f32 %v1326_v41, %v1289_v35  ;;  %v1520_v35 = vmul.f32 %v2556_v44, %v1497_v26 }
 0x30c   : > { %v1365_v42 = vmul.f32 %v1361_v48, %v1352_v40 }
 0x30d   : > { %v1522_v40 = vadd.f32 %v1520_v35, %v1483_v31 }
 0x30e   : > { %v1383_v61 = vpop.permute.xlu1 %1382  ;;  %v1367_v5 = vadd.f32 %v1365_v42, %v1328_v55 }
 0x30f   : > { %v1391_v62 = vrot.slane %v1383_v61, %v3259_v57 }
 0x311   : > { %v1404_v45 = vmul.f32 %v1400_v58, %v1391_v62  ;;  %v1577_v58 = vsub.s32 %v1574_v47, %v2994_v3 }
 0x313   : > { %v1406_v10 = vadd.f32 %v1404_v45, %v1367_v5  ;;  %v1461_v11 = vpop.permute.xlu1 %1460  ;;  %v900_v5 = vrot.slane %v886_v1, %v3185_v14  ;;  %v1673_v46 = vrot.slane %v1666_v56, %v1577_v58 }
 0x314   : > { %v1469_v15 = vrot.slane %v1461_v11, %v3259_v57 }
 0x315   : > { %v1445_v21 = vadd.f32 %v1443_v16, %v1406_v10  ;;  %v908_v53 = vrot.slane %v900_v5, %v3001_v4 }
 0x316   : > { %v1482_v6 = vmul.f32 %v1478_v50, %v1469_v15 }
 0x318   : > { %v1500_v24 = vpop.permute.xlu1 %1499  ;;  %v1484_v28 = vadd.f32 %v1482_v6, %v1445_v21  ;;  %v2910_v21 = vmov 49  }
 0x319   : > { %v1508_v25 = vrot.slane %v1500_v24, %v3259_v57  ;;  %2791 = vset.pattern.permute.xlu0 %v2910_v21 }
 0x31b   : > { %v1521_v29 = vmul.f32 %v1517_v22, %v1508_v25 }
 0x31d   : > { %v1523_v33 = vadd.f32 %v1521_v29, %v1484_v28  ;;  %v1528_v34 = vpop.permute.xlu1 %1527 }
 0x31e   : > { %v1536_v48 = vrot.slane %v1528_v34, %v3259_v57  ;;  %v2827_v57 = vld [vmem:[%s3598_s9 + $0x18] ss:$0 sps:$4 sm:$0xff]  }
 0x31f   : > { %v1562_v37 = vadd.f32 %v1560_v32, %v1523_v33  ;;  %v1724_v62 = vsel %vm1722_vm8, %v2827_v57, 0  ;;  %v2912_v32 = vmov 51   ;;  %v2913_v33 = vmov 50  }
 0x320   : > { %v1559_v41 = vmul.f32 %v2558_v18, %v1536_v48 }
 0x321   : > { %v1566_v43 = vmul.f32 0.2, %v1562_v37  ;;  %vm1564_vm5 = vcmp.ge.f32.partialorder %v1562_v37, 0.0 }
 0x322   : > { %v1561_v52 = vadd.f32 %v1559_v41, %v1522_v40 }
 0x323   : > { %v1568_v42 = vsel %vm1564_vm5, %v1562_v37, %v1566_v43  ;;  %v2916_v37 = vmov 55  }
 0x324   : > { %vm1563_vm6 = vcmp.ge.f32.partialorder %v1561_v52, 0.0  ;;  %v1565_v54 = vmul.f32 0.2, %v1561_v52 }
 0x326   : > { %v1567_v55 = vsel %vm1563_vm6, %v1561_v52, %v1565_v54  ;;  %v2356_v52 = vld [vmem:[%s3600_s11] sm:$0xf] }
 0x327   : > { %v1571_v59 = vcombine.low %v1567_v55, %v1568_v42  ;;  %v2362_v47 = vsel %vm1722_vm8, %v2356_v52, 0 }
 0x328   : > { %2649 = vmatpush3.bf16.msra.mxu0 %v2362_v47  ;;  %v2568_v47 = vld [vmem:[%s3599_s10 + $0x18] sm:$0xff] }
 0x329   : > { %v1578_v60 = vrot.slane %v1571_v59, %v1577_v58 }
 0x32b   : > { %v1580_v61 = vpack.c.bf16 %v1578_v60, %v1578_v60 }
 0x32d   : > { %2633 = vmatmul.mubr.msk.bf16.vlgmr.msra.gmra.mxu1 %vm1589_vm7, %v1580_v61 }
 0x32e   : > { %2644 = vmatprep.mubr.msk.bf16.mxu1 %vm2887_vm0, %v2885_v36  ;;  %2637 = vmatpush3.bf16.msra.mxu1 %v1724_v62  ;;  %vm2357_vm0 = vcmask 64512  }
 0x32f   : > { %2638 = vmatprep.subr.bf16.mxu1 %v2885_v36 }
 0x332   : > { %2639 = vmatpush3.bf16.msra.mxu1 %v2828_v49 }
 0x333   : > { %2640 = vmatprep.subr.bf16.mxu1 %v2885_v36 }
 0x336   : > { %2641 = vmatpush3.bf16.msra.mxu1 %v2829_v63 }
 0x337   : > { %2642 = vmatprep.subr.bf16.mxu1 %v2885_v36  ;;  %v2830_v36 = vld [vmem:[%s3598_s9] sm:$0xff]  }
 0x33a   : > { %2643 = vmatpush3.bf16.msra.mxu1 %v2830_v36 }
 0x3ed   : > { %v1627_v45 = vpop.f32.mrf.mxu1 }
 0x3ee   : > { %v1640_v9 = vrot.slane %v1627_v45, %v1577_v58  ;;  %v2918_v45 = vmov 839922192  }
 0x3ef   : > { %v2634_v10 = vpop.f32.mrf.mxu1 }
 0x3f0   : > { %v1641_v50 = vcombine.high %v1640_v9, %v1640_v9  ;;  %v1644_v11 = vadd.f32 %v1640_v9, %v904_v8 }
 0x3f1   : > { %v1630_v13 = vpop.f32.mrf.mxu1 }
 0x3f2   : > { %v1645_v15 = vadd.f32 %v1641_v50, %v908_v53  ;;  %v1658_v44 = vadd.f32 %v2561_v7, %v1644_v11  ;;  %v1859_v7 = vunpack.c.l.s4 %v2918_v45 }
 0x3f3   : > { %v2635_v16 = vpop.f32.mrf.mxu1 }
 0x3f4   : > { %v1659_v17 = vadd.f32 %v1655_v12, %v1645_v15  ;;  %v1662_v51 = vmul.f32 0.2, %v1658_v44  ;;  %vm1660_vm9 = vcmp.ge.f32.partialorder %v1658_v44, 0.0  ;;  %v1860_v36 = vunpack.c.0.s8 %v1859_v7  ;;  %v1852_v16 = vld [vmem:[%s3599_s10] sm:$0xff] }
 0x3f5   : > { %v1900_v56 = vcombine.high %v1852_v16, %v1852_v16 }
 0x3f6   : > { %v1663_v18 = vmul.f32 0.2, %v1659_v17  ;;  %vm1661_vm10 = vcmp.ge.f32.partialorder %v1659_v17, 0.0  ;;  %v1664_v6 = vsel %vm1660_vm9, %v1658_v44, %v1662_v51  ;;  %v3428_v50 = vsub.s32 %v1860_v36, %v2994_v3  ;;  %v2567_v44 = vld [vmem:[%s3599_s10 + $0x10] sm:$0xff]  ;;  %v2569_v51 = vld [vmem:[%s3599_s10 + $0x20] sm:$0xff]  ;;  %v2570_v36 = vld [vmem:[%s3599_s10 + $0x28] sm:$0xff] }
 0x3f8   : > { %v1665_v22 = vsel %vm1661_vm10, %v1659_v17, %v1663_v18 }
 0x3f9   : > { %v1677_v23 = vcombine.low %v1664_v6, %v1665_v22 }
 0x3fb   : > { %v1684_v24 = vrot.slane %v1677_v23, %v1577_v58 }
 0x3fd   : > { %1685 = vrot.lane.b32.xlu1 %v1684_v24, %s2911_s23 }
 0x46f   : > { %v1686_v25 = vpop.permute.xlu1 %1685 }
 0x470   : > { %v1688_v26 = vsel %vm834_vm4, %v1673_v46, %v1686_v25 }
 0x471   : > { %v1689_v27 = vpack.c.bf16 %v1688_v26, %v1688_v26  ;;  %v1818_v28 = vrot.slane %v1688_v26, %v3185_v14 }
 0x473   : > { %v1826_v29 = vrot.slane %v1818_v28, %v3185_v14  ;;  %2645 = vmatmul.mubr.msk.bf16.vlgmr.msra.gmra.mxu1 %vm1718_vm11, %v1689_v27  ;;  %v1819_v34 = vcombine.high %v1818_v28, %v1818_v28  ;;  %v2571_v28 = vld [vmem:[%s3599_s10 + $0x30] sm:$0xff] }
 0x475   : > { %v1839_v31 = vrot.slane %v1826_v29, %v3001_v4  ;;  %v1833_v35 = vrot.slane %v1819_v34, %v3185_v14  ;;  %v1834_v48 = vcombine.high %v1826_v29, %v1826_v29  ;;  %v3460_v29 = vld [vmem:[%s3599_s10 + $0x40] sm:$0xff]  ;;  %v3477_v34 = vld [vmem:[%s3599_s10 + $0x58] sm:$0xff] }
 0x477   : > { %1912 = vperm.xlu0 %2791, %v1839_v31   ;;  %1855 = vperm.xlu1 %2790, %v1839_v31   ;;  %v1843_v39 = vrot.slane %v1833_v35, %v3001_v4  ;;  %v1847_v40 = vrot.slane %v1834_v48, %v3001_v4  ;;  %v1835_v41 = vcombine.high %v1833_v35, %v1833_v35 }
 0x479   : > { %v1851_v43 = vrot.slane %v1835_v41, %v3001_v4  ;;  %v1853_v41 = vld [vmem:[%s3599_s10 + $0x8] sm:$0xff] }
 0x47b   : > { %2793 = vset.pattern.permute.xlu0 %v2912_v32  ;;  %2792 = vset.pattern.permute.xlu1 %v2913_v33 }
 0x47c   : > { %2034 = vperm.xlu0 %2793, %v1839_v31   ;;  %1973 = vperm.xlu1 %2792, %v1839_v31  }
 0x480   : > { %2795 = vset.pattern.permute.xlu0 %v2914_v20  ;;  %2794 = vset.pattern.permute.xlu1 %v2915_v30 }
 0x481   : > { %2156 = vperm.xlu0 %2795, %v1839_v31   ;;  %2095 = vperm.xlu1 %2794, %v1839_v31  }
 0x485   : > { %2797 = vset.pattern.permute.xlu0 %v2916_v37  ;;  %2796 = vset.pattern.permute.xlu1 %v2917_v38 }
 0x486   : > { %2278 = vperm.xlu0 %2797, %v1839_v31   ;;  %2217 = vperm.xlu1 %2796, %v1839_v31  }
 0x48a   : > { %2798 = vset.pattern.permute.xlu0 %v2909_v19  ;;  %2799 = vset.pattern.permute.xlu1 %v2909_v19 }
 0x48b   : > { %1877 = vperm.xlu1 %2799, %v1847_v40   ;;  %1866 = vperm.xlu0 %2798, %v1843_v39  }
 0x48f   : > { %2800 = vset.pattern.permute.xlu1 %v2910_v21  ;;  %2801 = vset.pattern.permute.xlu0 %v2913_v33 }
 0x490   : > { %1923 = vperm.xlu1 %2800, %v1843_v39   ;;  %1984 = vperm.xlu0 %2801, %v1843_v39  }
 0x494   : > { %1934 = vperm.xlu1 %2800, %v1847_v40   ;;  %2804 = vset.pattern.permute.xlu0 %v2915_v30 }
 0x495   : > { %2106 = vperm.xlu0 %2804, %v1843_v39  }
 0x498   : > { %2802 = vset.pattern.permute.xlu1 %v2913_v33 }
 0x499   : > { %1995 = vperm.xlu1 %2802, %v1847_v40   ;;  %2807 = vset.pattern.permute.xlu0 %v2917_v38 }
 0x49a   : > { %2228 = vperm.xlu0 %2807, %v1843_v39  }
 0x49d   : > { %2803 = vset.pattern.permute.xlu1 %v2912_v32 }
 0x49e   : > { %2045 = vperm.xlu1 %2803, %v1843_v39   ;;  %2811 = vset.pattern.permute.xlu0 %v2910_v21  ;;  %v1957_v21 = vcombine.high %v2567_v44, %v2567_v44 }
 0x49f   : > { %1945 = vperm.xlu0 %2811, %v1851_v43  }
 0x4a2   : > { %2056 = vperm.xlu1 %2803, %v1847_v40  }
 0x4a3   : > { %2813 = vset.pattern.permute.xlu0 %v2912_v32  ;;  %v3467_v32 = vld [vmem:[%s3599_s10 + $0x60] sm:$0xff] }
 0x4a4   : > { %2067 = vperm.xlu0 %2813, %v1851_v43  }
 0x4a6   : > { %2805 = vset.pattern.permute.xlu1 %v2915_v30 }
 0x4a7   : > { %2117 = vperm.xlu1 %2805, %v1847_v40  }
 0x4a8   : > { %2815 = vset.pattern.permute.xlu0 %v2914_v20 }
 0x4a9   : > { %2189 = vperm.xlu0 %2815, %v1851_v43  }
 0x4ab   : > { %2806 = vset.pattern.permute.xlu1 %v2914_v20  ;;  %v2018_v20 = vcombine.high %v2569_v51, %v2569_v51 }
 0x4ac   : > { %2167 = vperm.xlu1 %2806, %v1843_v39  }
 0x4ad   : > { %2818 = vset.pattern.permute.xlu0 %v2916_v37 }
 0x4ae   : > { %2311 = vperm.xlu0 %2818, %v1851_v43  }
 0x4b0   : > { %2178 = vperm.xlu1 %2806, %v1847_v40  }
 0x4b4   : > { %2808 = vset.pattern.permute.xlu1 %v2917_v38 }
 0x4b5   : > { %2239 = vperm.xlu1 %2808, %v1847_v40  }
 0x4b9   : > { %2809 = vset.pattern.permute.xlu1 %v2916_v37 }
 0x4ba   : > { %2289 = vperm.xlu1 %2809, %v1843_v39   ;;  %v2079_v39 = vcombine.high %v2571_v28, %v2571_v28 }
 0x4be   : > { %2810 = vset.pattern.permute.xlu1 %v2909_v19 }
 0x4bf   : > { %1888 = vperm.xlu1 %2810, %v1851_v43  }
 0x4c3   : > { %2812 = vset.pattern.permute.xlu1 %v2913_v33 }
 0x4c4   : > { %2006 = vperm.xlu1 %2812, %v1851_v43  }
 0x4c8   : > { %2814 = vset.pattern.permute.xlu1 %v2915_v30  ;;  %v3472_v30 = vld [vmem:[%s3599_s10 + $0x38] sm:$0xff] }
 0x4c9   : > { %2128 = vperm.xlu1 %2814, %v1851_v43  }
 0x4cd   : > { %2816 = vset.pattern.permute.xlu1 %v2917_v38  ;;  %v2262_v38 = vcombine.high %v3467_v32, %v3467_v32 }
 0x4ce   : > { %2250 = vperm.xlu1 %2816, %v1851_v43  }
 0x4d2   : > { %2817 = vset.pattern.permute.xlu1 %v2916_v37  ;;  %v2140_v37 = vcombine.high %v3460_v29, %v3460_v29 }
 0x4d3   : > { %2300 = vperm.xlu1 %2817, %v1847_v40  }
 0x4f2   : > { %v1856_v54 = vpop.permute.xlu1 %1855  ;;  %v1913_v59 = vpop.permute.xlu0 %1912 }
 0x4f3   : > { %v1921_v12 = vrot.slane %v1913_v59, %v3428_v50  ;;  %v1864_v13 = vrot.slane %v1856_v54, %v3428_v50  ;;  %v1958_v59 = vcombine.high %v2568_v47, %v2568_v47 }
 0x4f5   : > { %v1961_v18 = vmul.f32 %v2567_v44, %v1921_v12  ;;  %v1904_v19 = vmul.f32 %v1864_v13, %v1852_v16 }
 0x4f7   : > { %v1974_v55 = vpop.permute.xlu1 %1973  ;;  %v3405_v61 = vpop.permute.xlu0 %2034  ;;  %v1965_v27 = vadd.f32 %v1961_v18, %v1904_v19  ;;  %v2019_v18 = vcombine.high %v2570_v36, %v2570_v36 }
 0x4f8   : > { %v1982_v17 = vrot.slane %v1974_v55, %v3428_v50  ;;  %v2043_v31 = vrot.slane %v3405_v61, %v3428_v50  ;;  %v2080_v61 = vcombine.high %v3472_v30, %v3472_v30 }
 0x4fa   : > { %v2022_v23 = vmul.f32 %v2569_v51, %v1982_v17  ;;  %v2083_v7 = vmul.f32 %v2571_v28, %v2043_v31 }
 0x4fc   : > { %v3399_v42 = vpop.permute.xlu1 %2095  ;;  %v3409_v49 = vpop.permute.xlu0 %2156  ;;  %v2026_v48 = vadd.f32 %v2022_v23, %v1965_v27 }
 0x4fd   : > { %v2104_v40 = vrot.slane %v3399_v42, %v3428_v50  ;;  %v2575_v42 = vld [vmem:[%s3599_s10 + $0x50] sm:$0xff]  ;;  %v2165_v16 = vrot.slane %v3409_v49, %v3428_v50 }
 0x4fe   : > { %v2201_v13 = vcombine.high %v2575_v42, %v2575_v42  ;;  %v2087_v19 = vadd.f32 %v2083_v7, %v2026_v48 }
 0x501   : > { %v3401_v58 = vpop.permute.xlu1 %2217  ;;  %v3413_v0 = vpop.permute.xlu0 %2278 }
 0x506   : > { %v3403_v60 = vpop.permute.xlu1 %1877  ;;  %v1867_v2 = vpop.permute.xlu0 %1866 }
 0x507   : > { %v1875_v46 = vrot.slane %v1867_v2, %v3428_v50  ;;  %v1901_v2 = vcombine.high %v1853_v41, %v1853_v41 }
 0x509   : > { %v1905_v43 = vmul.f32 %v1900_v56, %v1875_v46  ;;  %v2574_v56 = vld [vmem:[%s3599_s10 + $0x48] sm:$0xff]  ;;  %v1886_v46 = vrot.slane %v3403_v60, %v3428_v50 }
 0x50a   : > { %v2141_v27 = vcombine.high %v2574_v56, %v2574_v56 }
 0x50b   : > { %v1924_v57 = vpop.permute.xlu1 %1923  ;;  %v3419_v8 = vpop.permute.xlu0 %1984 }
 0x50c   : > { %v1932_v6 = vrot.slane %v1924_v57, %v3428_v50  ;;  %v1993_v52 = vrot.slane %v3419_v8, %v3428_v50  ;;  %v2202_v57 = vcombine.high %v3477_v34, %v3477_v34  ;;  %v3505_v8 = vld [vmem:[%s3599_s10 + $0x70] sm:$0xff] }
 0x50d   : > { %v2323_v51 = vcombine.high %v3505_v8, %v3505_v8 }
 0x50e   : > { %v1962_v33 = vmul.f32 %v1957_v21, %v1932_v6  ;;  %v2144_v21 = vmul.f32 %v3460_v29, %v2104_v40  ;;  %v2023_v6 = vmul.f32 %v2018_v20, %v1993_v52 }
 0x50f   : > { %v3407_v62 = vpop.permute.xlu1 %1934 }
 0x510   : > { %v3425_v53 = vpop.permute.xlu0 %2106  ;;  %v1943_v49 = vrot.slane %v3407_v62, %v3428_v50  ;;  %v2148_v40 = vadd.f32 %v2144_v21, %v2087_v19 }
 0x511   : > { %v2115_v29 = vrot.slane %v3425_v53, %v3428_v50  ;;  %v2226_v53 = vrot.slane %v3401_v58, %v3428_v50 }
 0x514   : > { %v3411_v63 = vpop.permute.xlu1 %1995 }
 0x515   : > { %v3434_v15 = vpop.permute.xlu0 %2228  ;;  %v2004_v62 = vrot.slane %v3411_v63, %v3428_v50 }
 0x516   : > { %v2237_v63 = vrot.slane %v3434_v15, %v3428_v50 }
 0x519   : > { %v3415_v1 = vpop.permute.xlu1 %2045 }
 0x51a   : > { %v1946_v24 = vpop.permute.xlu0 %1945  ;;  %v2054_v54 = vrot.slane %v3415_v1, %v3428_v50  ;;  %v1966_v1 = vadd.f32 %v1962_v33, %v1905_v43 }
 0x51b   : > { %v1954_v17 = vrot.slane %v1946_v24, %v3428_v50  ;;  %v3527_v24 = vld [vmem:[%s3599_s10 + $0x68] sm:$0xff] }
 0x51c   : > { %v2084_v23 = vmul.f32 %v2079_v39, %v2054_v54  ;;  %v2027_v28 = vadd.f32 %v2023_v6, %v1966_v1  ;;  %v2263_v60 = vcombine.high %v3527_v24, %v3527_v24  ;;  %v2205_v39 = vmul.f32 %v2575_v42, %v2165_v16 }
 0x51d   : > { %v3417_v5 = vpop.permute.xlu1 %2056  ;;  %v1964_v20 = vmul.f32 %v1958_v59, %v1954_v17  ;;  %v1963_v54 = vmul.f32 %v2568_v47, %v1943_v49  ;;  %v2024_v1 = vmul.f32 %v2570_v36, %v2004_v62  ;;  %v2266_v17 = vmul.f32 %v3467_v32, %v2226_v53 }
 0x51e   : > { %v2088_v43 = vadd.f32 %v2084_v23, %v2027_v28  ;;  %v2065_v59 = vrot.slane %v3417_v5, %v3428_v50  ;;  %v2209_v15 = vadd.f32 %v2205_v39, %v2148_v40  ;;  %v2267_v23 = vmul.f32 %v2262_v38, %v2237_v63 }
 0x51f   : > { %v2068_v12 = vpop.permute.xlu0 %2067 }
 0x522   : > { %v3421_v9 = vpop.permute.xlu1 %2117 }
 0x524   : > { %v2190_v52 = vpop.permute.xlu0 %2189 }
 0x527   : > { %v3423_v10 = vpop.permute.xlu1 %2167 }
 0x528   : > { %v2176_v31 = vrot.slane %v3423_v10, %v3428_v50  ;;  %v1906_v10 = vmul.f32 %v1886_v46, %v1853_v41  ;;  %v2198_v41 = vrot.slane %v2190_v52, %v3428_v50 }
 0x52a   : > { %v2206_v7 = vmul.f32 %v2201_v13, %v2176_v31  ;;  %v1967_v5 = vadd.f32 %v1963_v54, %v1906_v10 }
 0x52b   : > { %v3430_v11 = vpop.permute.xlu1 %2178 }
 0x52c   : > { %v2187_v19 = vrot.slane %v3430_v11, %v3428_v50  ;;  %v2028_v6 = vadd.f32 %v2024_v1, %v1967_v5 }
 0x52e   : > { %v2207_v32 = vmul.f32 %v3477_v34, %v2187_v19 }
 0x530   : > { %v3443_v3 = vpop.permute.xlu1 %2239 }
 0x531   : > { %v2248_v49 = vrot.slane %v3443_v3, %v3428_v50 }
 0x533   : > { %v3449_v22 = vpop.f32.mrf.mxu1  ;;  %v2268_v3 = vmul.f32 %v3527_v24, %v2248_v49 }
 0x535   : > { %v3452_v25 = vpop.permute.xlu1 %2289  ;;  %v2646_v26 = vpop.f32.mrf.mxu1 }
 0x537   : > { %v1763_v35 = vpop.f32.mrf.mxu1 }
 0x538   : > { %v2076_v35 = vrot.slane %v2068_v12, %v3428_v50  ;;  %v2126_v12 = vrot.slane %v3421_v9, %v3428_v50  ;;  %v2580_v9 = vld [vmem:[%s3599_s10 + $0x78] sm:$0xff] }
 0x539   : > { %v2647_v55 = vpop.f32.mrf.mxu1 }
 0x53a   : > { %v1889_v45 = vpop.permute.xlu1 %1888  ;;  %v2086_v42 = vmul.f32 %v2080_v61, %v2076_v35  ;;  %v2085_v61 = vmul.f32 %v3472_v30, %v2065_v59  ;;  %v2146_v46 = vmul.f32 %v2574_v56, %v2126_v12  ;;  %v2208_v30 = vmul.f32 %v2202_v57, %v2198_v41 }
 0x53b   : > { %v1897_v44 = vrot.slane %v1889_v45, %v3428_v50  ;;  %v2145_v45 = vmul.f32 %v2140_v37, %v2115_v29  ;;  %v2298_v37 = vrot.slane %v3452_v25, %v3428_v50  ;;  %v2287_v25 = vrot.slane %v3413_v0, %v3428_v50 }
 0x53c   : > { %v2324_v29 = vcombine.high %v2580_v9, %v2580_v9 }
 0x53d   : > { %v1907_v26 = vmul.f32 %v1901_v2, %v1897_v44  ;;  %v2149_v47 = vadd.f32 %v2145_v45, %v2088_v43  ;;  %v2327_v57 = vmul.f32 %v3505_v8, %v2287_v25 }
 0x53f   : > { %v2007_v33 = vpop.permute.xlu1 %2006  ;;  %v1968_v55 = vadd.f32 %v1964_v20, %v1907_v26  ;;  %v2210_v36 = vadd.f32 %v2206_v7, %v2149_v47  ;;  %v2328_v26 = vmul.f32 %v2323_v51, %v2298_v37 }
 0x540   : > { %v2015_v48 = vrot.slane %v2007_v33, %v3428_v50  ;;  %v2089_v33 = vadd.f32 %v2085_v61, %v2028_v6 }
 0x541   : > { %v2271_v38 = vadd.f32 %v2267_v23, %v2210_v36 }
 0x542   : > { %v2025_v2 = vmul.f32 %v2019_v18, %v2015_v48  ;;  %v2312_v18 = vpop.permute.xlu0 %2311  ;;  %v2150_v20 = vadd.f32 %v2146_v46, %v2089_v33 }
 0x543   : > { %v2320_v0 = vrot.slane %v2312_v18, %v3428_v50  ;;  %v2332_v51 = vadd.f32 %v2328_v26, %v2271_v38 }
 0x544   : > { %v2029_v58 = vadd.f32 %v2025_v2, %v1968_v55  ;;  %v2129_v44 = vpop.permute.xlu1 %2128  ;;  %v2211_v53 = vadd.f32 %v2207_v32, %v2150_v20 }
 0x545   : > { %v2137_v16 = vrot.slane %v2129_v44, %v3428_v50  ;;  %v2330_v35 = vmul.f32 %v2324_v29, %v2320_v0  ;;  %v2340_v54 = vmul.f32 0.2, %v2332_v51  ;;  %vm2336_vm12 = vcmp.ge.f32.partialorder %v2332_v51, 0.0 }
 0x546   : > { %v2090_v13 = vadd.f32 %v2086_v42, %v2029_v58  ;;  %v2272_v10 = vadd.f32 %v2268_v3, %v2211_v53  ;;  %v1773_v42 = vrot.slane %v3449_v22, %v3185_v14 }
 0x547   : > { %v2147_v21 = vmul.f32 %v2141_v27, %v2137_v16  ;;  %v2270_v27 = vadd.f32 %v2266_v17, %v2209_v15  ;;  %v2344_v8 = vsel %vm2336_vm12, %v2332_v51, %v2340_v54 }
 0x548   : > { %v1774_v12 = vcombine.high %v1773_v42, %v1773_v42  ;;  %v1781_v58 = vrot.slane %v1773_v42, %v3185_v14 }
 0x549   : > { %v2151_v28 = vadd.f32 %v2147_v21, %v2090_v13  ;;  %v2251_v11 = vpop.permute.xlu1 %2250  ;;  %v2331_v40 = vadd.f32 %v2327_v57, %v2270_v27 }
 0x54a   : > { %v2259_v31 = vrot.slane %v2251_v11, %v3428_v50  ;;  %v1788_v44 = vrot.slane %v1774_v12, %v3185_v14  ;;  %v1789_v41 = vcombine.high %v1781_v58, %v1781_v58  ;;  %v1794_v16 = vrot.slane %v1781_v58, %v3001_v4 }
 0x54b   : > { %v2212_v56 = vadd.f32 %v2208_v30, %v2151_v28  ;;  %v2339_v55 = vmul.f32 0.2, %v2331_v40  ;;  %vm2335_vm13 = vcmp.ge.f32.partialorder %v2331_v40, 0.0 }
 0x54c   : > { %v2269_v62 = vmul.f32 %v2263_v60, %v2259_v31  ;;  %v1790_v37 = vcombine.high %v1788_v44, %v1788_v44  ;;  %v1798_v15 = vrot.slane %v1788_v44, %v3001_v4  ;;  %v1802_v14 = vrot.slane %v1789_v41, %v3001_v4 }
 0x54d   : > { %v2343_v45 = vsel %vm2335_vm13, %v2331_v40, %v2339_v55 }
 0x54e   : > { %v2273_v48 = vadd.f32 %v2269_v62, %v2212_v56  ;;  %v2301_v39 = vpop.permute.xlu1 %2300  ;;  %v2351_v7 = vcombine.low %v2343_v45, %v2344_v8 }
 0x54f   : > { %v2309_v43 = vrot.slane %v2301_v39, %v3428_v50 }
 0x550   : > { %v2334_v52 = vadd.f32 %v2330_v35, %v2273_v48 }
 0x551   : > { %v2329_v34 = vmul.f32 %v2580_v9, %v2309_v43  ;;  %v1806_v9 = vrot.slane %v1790_v37, %v3001_v4 }
 0x552   : > { %v2342_v60 = vmul.f32 0.2, %v2334_v52  ;;  %vm2338_vm14 = vcmp.ge.f32.partialorder %v2334_v52, 0.0 }
 0x553   : > { %v2333_v2 = vadd.f32 %v2329_v34, %v2272_v10 }
 0x554   : > { %v2346_v63 = vsel %vm2338_vm14, %v2334_v52, %v2342_v60 }
 0x555   : > { %vm2337_vm15 = vcmp.ge.f32.partialorder %v2333_v2, 0.0  ;;  %v2341_v24 = vmul.f32 0.2, %v2333_v2 }
 0x557   : > { %v2345_v59 = vsel %vm2337_vm15, %v2333_v2, %v2341_v24 }
 0x558   : > { %v2352_v1 = vcombine.low %v2345_v59, %v2346_v63 }
 0x55a   : > { %v2355_v50 = vpack.c.bf16 %v2352_v1, %v2351_v7 }
 0x55c   : > { %2651 = vmatmul.mubr.msk.bf16.vlgmr.msra.gmra.mxu0 %vm2357_vm0, %v2355_v50 }
 0x61c   : > { %v2398_v47 = vpop.f32.mrf.mxu0 }
 0x61d   : > { %v2407_v17 = vcombine.high %v2398_v47, %v2398_v47  ;;  %v2411_v13 = vadd.f32 %v2398_v47, %v1794_v16 }
 0x61e   : > { %v2652_v5 = vpop.f32.mrf.mxu0 }
 0x61f   : > { %v2412_v61 = vadd.f32 %v2407_v17, %v1798_v15 }
 0x620   : > { %v2401_v36 = vpop.f32.mrf.mxu0 }
 0x621   : > { %v2419_v22 = vcombine.low %v2411_v13, %v2412_v61  ;;  %v2408_v18 = vcombine.high %v2401_v36, %v2401_v36  ;;  %v2413_v25 = vadd.f32 %v2401_v36, %v1802_v14 }
 0x622   : > { %v2653_v19 = vpop.f32.mrf.mxu0 }
 0x623   : > { %v2424_v21 = vsel %vm2423_vm1, %v2419_v22, 0.0  ;;  %v2414_v6 = vadd.f32 %v2408_v18, %v1806_v9 }
 0x624   : > { %2426 = vst [vmem:[%s407_s29] sm:$0xff] %v2424_v21 }
 0x625   : > { %v2420_v23 = vcombine.low %v2413_v25, %v2414_v6 }
 0x627   : > { %v2425_v46 = vsel %vm2423_vm1, %v2420_v23, 0.0 }
 0x628   : > { %2427 = vst [vmem:[%s407_s29 + $0x8] sm:$0xff] %v2425_v46 }
 0x629 PF: > { %s22_s21 = sadd.s32 1, %s2853_s21  }
 0x62a   : > { %p19_p4 = scmp.ge.s32.totalorder %s22_s21, 4  }
 0x62c   :  { %21 = sbr.rel (!%p19_p4) target bundleno = 1 (0x1), region = 151 }

</bundles_post_ra>
